<compile_context>
chip_gen: v7x
topology: tpu7x:2x2x1
jax: 0.10.0
libtpu: 0.0.40
codegen_flags: <defaults>
</compile_context>

<pallas_src>
import jax
import jax.numpy as jnp
from jax.experimental import pallas as pl
from jax.experimental.pallas import tpu as pltpu


def _pick_batch_block(n, h, target_rows=256):
    """Batch block Nb so that M = Nb*H ~ target_rows; single step for tiny N."""
    nb = max(1, target_rows // h)
    if n <= nb:
        return n                      # one grid step, block == full (padded) batch
    # multi-step: keep Nb a multiple of 8 so the (Nb, K) output block is tileable
    return max(8, (nb // 8) * 8)


def _banded_conv_weights(w_oihw, width):
    """(Cout,Cin,3,3) OIHW -> (3, width*Cin, width*Cout) row-banded matrices.

    mats[dy] applies, for one vertically shifted input row, all 3 horizontal
    taps of a 3x3 SAME conv as a single matmul over the flattened (x, channel)
    lane axis; horizontal zero padding is encoded by the clipped off-diagonals.
    """
    cout, cin, kh, kw = w_oihw.shape
    w_hwio = jnp.transpose(w_oihw, (2, 3, 1, 0))          # (kh, kw, Cin, Cout)
    mats = []
    for dy in range(kh):
        m = jnp.zeros((width * cin, width * cout), w_hwio.dtype)
        for dx in range(kw):
            # shift[x_in, x_out] = 1  iff  x_in == x_out + dx - 1 (in range)
            shift = jnp.eye(width, width, k=1 - dx, dtype=w_hwio.dtype)
            m = m + jnp.kron(shift, w_hwio[dy, dx])
        mats.append(m)
    return jnp.stack(mats, axis=0)


def simple_convnet_forward(x_nchw, params, *, target_rows=256):
    x = jnp.transpose(x_nchw, (0, 2, 3, 1)).astype(jnp.float32)   # NCHW -> NHWC
    N, H, W, Cin = x.shape
    C1 = params["w1"].shape[0]
    C2 = params["w2"].shape[0]
    K = params["fc_w"].shape[0]

    # ---- trace-time layout plumbing (constant w.r.t. the kernel) -----------
    Cp = ((Cin + 7) // 8) * 8                              # pad Cin 3 -> 8 (W*Cp = 128)
    xp = jnp.pad(x, ((0, 0), (0, 0), (0, 0), (0, Cp - Cin)))
    x_rows = xp.reshape(N, H, W * Cp)                      # lane-dense rows
    x_vpad = jnp.pad(x_rows, ((0, 0), (1, 1), (0, 0)))     # vertical SAME padding
    # stack the 3 vertical taps along the lane axis -> conv1 is one matmul
    x_stk = jnp.concatenate(
        [x_vpad[:, 0:H], x_vpad[:, 1:H + 1], x_vpad[:, 2:H + 2]], axis=-1
    )                                                      # (N, H, 3*W*Cp)

    w1p = jnp.pad(params["w1"].astype(jnp.float32),
                  ((0, 0), (0, Cp - Cin), (0, 0), (0, 0)))
    w1cat = _banded_conv_weights(w1p, W).reshape(3 * W * Cp, W * C1)      # (384, 256)
    w2cat = _banded_conv_weights(params["w2"].astype(jnp.float32),
                                 W).reshape(3 * W * C1, W * C2)           # (768, 512)
    b1t = jnp.tile(params["b1"].reshape(1, C1).astype(jnp.float32), (1, W))
    b2t = jnp.tile(params["b2"].reshape(1, C2).astype(jnp.float32), (1, W))
    fcw = jnp.tile(params["fc_w"].T.astype(jnp.float32), (W, 1)) / float(H * W)
    fcb = params["fc_b"].reshape(1, K).astype(jnp.float32)

    Nb = _pick_batch_block(N, H, target_rows)
    Np = ((N + Nb - 1) // Nb) * Nb                         # pad batch, never drop images
    if Np != N:
        x_stk = jnp.pad(x_stk, ((0, Np - N), (0, 0), (0, 0)))
    M = Nb * H

    def kernel(x_ref, w1_ref, b1_ref, w2_ref, b2_ref, fcw_ref, fcb_ref,
               out_ref, h1s_ref):
        # ---- conv1 + ReLU: one matmul, vertical taps pre-stacked along K ----
        lhs1 = x_ref[...].reshape(M, 3 * W * Cp)
        h1 = jnp.maximum(
            jnp.dot(lhs1, w1_ref[...], preferred_element_type=jnp.float32)
            + b1_ref[...], 0.0)                            # (M, W*C1)

        # ---- build conv2 LHS: [h1[y-1] | h1[y] | h1[y+1]] -------------------
        # one aligned store, two row-offset reads; per-image boundary rows are
        # zeroed with a select (pad rows of the scratch never need init).
        h1s_ref[8:8 + M, :] = h1
        down = h1s_ref[7:7 + M, :]                         # h1[y-1] (junk at image tops)
        up = h1s_ref[9:9 + M, :]                           # h1[y+1] (junk at image bottoms)
        rem = jax.lax.rem(
            jax.lax.broadcasted_iota(jnp.int32, (M, 1), 0), jnp.int32(H))
        down = jnp.where(rem == 0, 0.0, down)
        up = jnp.where(rem == H - 1, 0.0, up)

        # ---- conv2 + ReLU: one matmul with K = 3*W*C1 = 768 -----------------
        lhs2 = jnp.concatenate([down, h1, up], axis=1)     # (M, 768)
        h2 = jnp.maximum(
            jnp.dot(lhs2, w2_ref[...], preferred_element_type=jnp.float32)
            + b2_ref[...], 0.0)                            # (M, W*C2)

        # ---- global avg pool (sum over rows; 1/(H*W) folded into fcw) + fc --
        pooled = jnp.sum(h2.reshape(Nb, H, W * C2), axis=1)          # (Nb, W*C2)
        logits = jnp.dot(pooled, fcw_ref[...],
                         preferred_element_type=jnp.float32) + fcb_ref[...]
        out_ref[...] = logits.astype(out_ref.dtype)

    out = pl.pallas_call(
        kernel,
        out_shape=jax.ShapeDtypeStruct((Np, K), jnp.float32),
        grid=(Np // Nb,),
        in_specs=[
            pl.BlockSpec((Nb, H, 3 * W * Cp), lambda n: (n, 0, 0)),
            pl.BlockSpec((3 * W * Cp, W * C1), lambda n: (0, 0)),
            pl.BlockSpec((1, W * C1), lambda n: (0, 0)),
            pl.BlockSpec((3 * W * C1, W * C2), lambda n: (0, 0)),
            pl.BlockSpec((1, W * C2), lambda n: (0, 0)),
            pl.BlockSpec((W * C2, K), lambda n: (0, 0)),
            pl.BlockSpec((1, K), lambda n: (0, 0)),
        ],
        out_specs=pl.BlockSpec((Nb, K), lambda n: (n, 0)),
        scratch_shapes=[
            pltpu.VMEM((M + 16, W * C1), jnp.float32),     # h1 staging (flat, aligned)
        ],
        compiler_params=pltpu.CompilerParams(
            dimension_semantics=("parallel",),
            vmem_limit_bytes=32 * 1024 * 1024,
        ),
    )(x_stk, w1cat, b1t, w2cat, b2t, fcw, fcb)
    return out[:N]


# ---------------------------------------------------------------------------
# Deterministic parameter init (PyTorch-like layouts & uniform fan-in scaling)
# ---------------------------------------------------------------------------
def init_params(key):
    ks = jax.random.split(key, 6)

    def u(k, shape, fan_in):
        bound = 1.0 / (fan_in ** 0.5)
        return jax.random.uniform(k, shape, jnp.float32, -bound, bound)

    return dict(
        w1=u(ks[0], (16, 3, 3, 3), 3 * 9),      # OIHW, nn.Conv2d(3, 16, 3, padding=1)
        b1=u(ks[1], (16,), 3 * 9),
        w2=u(ks[2], (32, 16, 3, 3), 16 * 9),    # nn.Conv2d(16, 32, 3, padding=1)
        b2=u(ks[3], (32,), 16 * 9),
        fc_w=u(ks[4], (10, 32), 32),            # nn.Linear(32, 10): (out, in)
        fc_b=u(ks[5], (10,), 32),
    )


# ---------------------------------------------------------------------------
# Pure-JAX reference for correctness
# ---------------------------------------------------------------------------
def ref_forward(x_nchw, params):
    dn = ("NCHW", "OIHW", "NCHW")
    h = jax.lax.conv_general_dilated(x_nchw.astype(jnp.float32), params["w1"],
                                     (1, 1), "SAME", dimension_numbers=dn)
    h = jnp.maximum(h + params["b1"][None, :, None, None], 0.0)
    h = jax.lax.conv_general_dilated(h, params["w2"], (1, 1), "SAME",
                                     dimension_numbers=dn)
    h = jnp.maximum(h + params["b2"][None, :, None, None], 0.0)
    pooled = jnp.mean(h, axis=(2, 3))                    # AdaptiveAvgPool2d((1,1))
    return pooled @ params["fc_w"].T + params["fc_b"]


if __name__ == "__main__":
    key = jax.random.PRNGKey(0)
    kx, kp = jax.random.split(key)
    x = jax.random.normal(kx, (2, 3, 16, 16), jnp.float32)   # NCHW, like PyTorch
    params = init_params(kp)

    out = jax.jit(simple_convnet_forward)(x, params)
    out = jax.block_until_ready(out)
    assert out.shape == (2, 10), out.shape

    ref = ref_forward(x, params)
    err = float(jnp.max(jnp.abs(out - ref)))
    assert jnp.allclose(out, ref, atol=1e-4, rtol=1e-4), f"max abs err {err}"

    print("KERNEL_OK")
</pallas_src>

<mosaic_0001>
module attributes {stable_mosaic.version = 11 : i64} {
  func.func @kernel(%arg0: i32, %arg1: memref<2x16x384xf32, #tpu.memory_space<vmem>>, %arg2: memref<384x256xf32, #tpu.memory_space<vmem>>, %arg3: memref<1x256xf32, #tpu.memory_space<vmem>>, %arg4: memref<768x512xf32, #tpu.memory_space<vmem>>, %arg5: memref<1x512xf32, #tpu.memory_space<vmem>>, %arg6: memref<512x10xf32, #tpu.memory_space<vmem>>, %arg7: memref<1x10xf32, #tpu.memory_space<vmem>>, %arg8: memref<2x10xf32, #tpu.memory_space<vmem>>, %arg9: memref<48x256xf32, #tpu.memory_space<vmem>>) attributes {dimension_semantics = [#tpu.dimension_semantics<parallel>], iteration_bounds = array<i64: 1>, scalar_prefetch = 0 : i64, scratch_operands = 1 : i64, tpu.core_type = #tpu.core_type<tc>, window_params = [{transform_indices = @transform_0, window_bounds = array<i64: 2, 16, 384>}, {pipeline_mode = #tpu.pipeline_mode<synchronous>, transform_indices = @transform_1, window_bounds = array<i64: 384, 256>}, {pipeline_mode = #tpu.pipeline_mode<synchronous>, transform_indices = @transform_2, window_bounds = array<i64: 1, 256>}, {pipeline_mode = #tpu.pipeline_mode<synchronous>, transform_indices = @transform_3, window_bounds = array<i64: 768, 512>}, {pipeline_mode = #tpu.pipeline_mode<synchronous>, transform_indices = @transform_4, window_bounds = array<i64: 1, 512>}, {pipeline_mode = #tpu.pipeline_mode<synchronous>, transform_indices = @transform_5, window_bounds = array<i64: 512, 10>}, {pipeline_mode = #tpu.pipeline_mode<synchronous>, transform_indices = @transform_6, window_bounds = array<i64: 1, 10>}, {transform_indices = @transform_7, window_bounds = array<i64: 2, 10>}]} {
    %c0 = arith.constant 0 : index
    %c0_0 = arith.constant 0 : index
    %c0_1 = arith.constant 0 : index
    %0 = vector.load %arg1[%c0, %c0_0, %c0_1] : memref<2x16x384xf32, #tpu.memory_space<vmem>>, vector<2x16x384xf32>
    %1 = vector.shape_cast %0 : vector<2x16x384xf32> to vector<32x384xf32>
    %c0_2 = arith.constant 0 : index
    %c0_3 = arith.constant 0 : index
    %2 = vector.load %arg2[%c0_2, %c0_3] : memref<384x256xf32, #tpu.memory_space<vmem>>, vector<384x256xf32>
    %cst = arith.constant dense<0.000000e+00> : vector<32x256xf32>
    %3 = tpu.matmul %1, %2, %cst {dimension_numbers = #tpu.dot_dimension_numbers<[1], [0], [0], [1], [0, 0, 1, 1], [], []>} : vector<32x384xf32>, vector<384x256xf32>, vector<32x256xf32> -> vector<32x256xf32>
    %c0_4 = arith.constant 0 : index
    %c0_5 = arith.constant 0 : index
    %4 = vector.load %arg3[%c0_4, %c0_5] : memref<1x256xf32, #tpu.memory_space<vmem>>, vector<1x256xf32>
    %5 = vector.broadcast %4 : vector<1x256xf32> to vector<32x256xf32>
    %6 = arith.addf %3, %5 : vector<32x256xf32>
    %cst_6 = arith.constant 0.000000e+00 : f32
    %7 = vector.broadcast %cst_6 : f32 to vector<32x256xf32>
    %8 = arith.maximumf %6, %7 : vector<32x256xf32>
    %c8 = arith.constant 8 : index
    %c0_7 = arith.constant 0 : index
    %9 = vector.load %arg9[%c8, %c0_7] : memref<48x256xf32, #tpu.memory_space<vmem>>, vector<32x256xf32>
    tpu.vector_store %arg9[%c8, %c0_7], %8 {strides = array<i32>} : memref<48x256xf32, #tpu.memory_space<vmem>>, vector<32x256xf32>,
    %c7 = arith.constant 7 : index
    %c0_8 = arith.constant 0 : index
    %10 = vector.load %arg9[%c7, %c0_8] : memref<48x256xf32, #tpu.memory_space<vmem>>, vector<32x256xf32>
    %c9 = arith.constant 9 : index
    %c0_9 = arith.constant 0 : index
    %11 = vector.load %arg9[%c9, %c0_9] : memref<48x256xf32, #tpu.memory_space<vmem>>, vector<32x256xf32>
    %12 = tpu.iota {dimensions = array<i32: 0>} : vector<32x1xi32>
    %c16_i32 = arith.constant 16 : i32
    %13 = vector.broadcast %c16_i32 : i32 to vector<32x1xi32>
    %14 = arith.remsi %12, %13 : vector<32x1xi32>
    %c0_i32 = arith.constant 0 : i32
    %15 = vector.broadcast %c0_i32 : i32 to vector<32x1xi32>
    %16 = arith.cmpi eq, %14, %15 : vector<32x1xi32>
    %cst_10 = arith.constant 0.000000e+00 : f32
    %17 = vector.shape_cast %16 : vector<32x1xi1> to vector<32x1xi1>
    %18 = vector.broadcast %17 : vector<32x1xi1> to vector<32x256xi1>
    %19 = vector.broadcast %cst_10 : f32 to vector<32x256xf32>
    %20 = arith.select %18, %19, %10 : vector<32x256xi1>, vector<32x256xf32>
    %c15_i32 = arith.constant 15 : i32
    %21 = vector.broadcast %c15_i32 : i32 to vector<32x1xi32>
    %22 = arith.cmpi eq, %14, %21 : vector<32x1xi32>
    %cst_11 = arith.constant 0.000000e+00 : f32
    %23 = vector.shape_cast %22 : vector<32x1xi1> to vector<32x1xi1>
    %24 = vector.broadcast %23 : vector<32x1xi1> to vector<32x256xi1>
    %25 = vector.broadcast %cst_11 : f32 to vector<32x256xf32>
    %26 = arith.select %24, %25, %11 : vector<32x256xi1>, vector<32x256xf32>
    %27 = tpu.concatenate %20, %8, %26 in 1 : vector<32x256xf32>, vector<32x256xf32>, vector<32x256xf32> -> vector<32x768xf32>
    %c0_12 = arith.constant 0 : index
    %c0_13 = arith.constant 0 : index
    %28 = vector.load %arg4[%c0_12, %c0_13] : memref<768x512xf32, #tpu.memory_space<vmem>>, vector<768x512xf32>
    %cst_14 = arith.constant dense<0.000000e+00> : vector<32x512xf32>
    %29 = tpu.matmul %27, %28, %cst_14 {dimension_numbers = #tpu.dot_dimension_numbers<[1], [0], [0], [1], [0, 0, 1, 1], [], []>} : vector<32x768xf32>, vector<768x512xf32>, vector<32x512xf32> -> vector<32x512xf32>
    %c0_15 = arith.constant 0 : index
    %c0_16 = arith.constant 0 : index
    %30 = vector.load %arg5[%c0_15, %c0_16] : memref<1x512xf32, #tpu.memory_space<vmem>>, vector<1x512xf32>
    %31 = vector.broadcast %30 : vector<1x512xf32> to vector<32x512xf32>
    %32 = arith.addf %29, %31 : vector<32x512xf32>
    %cst_17 = arith.constant 0.000000e+00 : f32
    %33 = vector.broadcast %cst_17 : f32 to vector<32x512xf32>
    %34 = arith.maximumf %32, %33 : vector<32x512xf32>
    %35 = vector.shape_cast %34 : vector<32x512xf32> to vector<2x16x512xf32>
    %cst_18 = arith.constant dense<0.000000e+00> : vector<2x512xf32>
    %36 = vector.multi_reduction <add>, %35, %cst_18 [1] : vector<2x16x512xf32> to vector<2x512xf32>
    %c0_19 = arith.constant 0 : index
    %c0_20 = arith.constant 0 : index
    %37 = vector.load %arg6[%c0_19, %c0_20] : memref<512x10xf32, #tpu.memory_space<vmem>>, vector<512x10xf32>
    %cst_21 = arith.constant dense<0.000000e+00> : vector<2x10xf32>
    %38 = tpu.matmul %36, %37, %cst_21 {dimension_numbers = #tpu.dot_dimension_numbers<[1], [0], [0], [1], [0, 0, 1, 1], [], []>} : vector<2x512xf32>, vector<512x10xf32>, vector<2x10xf32> -> vector<2x10xf32>
    %c0_22 = arith.constant 0 : index
    %c0_23 = arith.constant 0 : index
    %39 = vector.load %arg7[%c0_22, %c0_23] : memref<1x10xf32, #tpu.memory_space<vmem>>, vector<1x10xf32>
    %40 = vector.broadcast %39 : vector<1x10xf32> to vector<2x10xf32>
    %41 = arith.addf %38, %40 : vector<2x10xf32>
    %c0_24 = arith.constant 0 : index
    %c0_25 = arith.constant 0 : index
    %42 = vector.load %arg8[%c0_24, %c0_25] : memref<2x10xf32, #tpu.memory_space<vmem>>, vector<2x10xf32>
    tpu.vector_store %arg8[%c0_24, %c0_25], %41 {strides = array<i32>} : memref<2x10xf32, #tpu.memory_space<vmem>>, vector<2x10xf32>,
    return
  }
  func.func @transform_0(%arg0: i32) -> (i32, i32, i32) {
    %c0_i32 = arith.constant 0 : i32
    %c0_i32_0 = arith.constant 0 : i32
    %c0_i32_1 = arith.constant 0 : i32
    return %arg0, %c0_i32, %c0_i32_0 : i32, i32, i32
  }
  func.func @transform_1(%arg0: i32) -> (i32, i32) {
    %c0_i32 = arith.constant 0 : i32
    %c0_i32_0 = arith.constant 0 : i32
    %c0_i32_1 = arith.constant 0 : i32
    return %c0_i32, %c0_i32_0 : i32, i32
  }
  func.func @transform_2(%arg0: i32) -> (i32, i32) {
    %c0_i32 = arith.constant 0 : i32
    %c0_i32_0 = arith.constant 0 : i32
    %c0_i32_1 = arith.constant 0 : i32
    return %c0_i32, %c0_i32_0 : i32, i32
  }
  func.func @transform_3(%arg0: i32) -> (i32, i32) {
    %c0_i32 = arith.constant 0 : i32
    %c0_i32_0 = arith.constant 0 : i32
    %c0_i32_1 = arith.constant 0 : i32
    return %c0_i32, %c0_i32_0 : i32, i32
  }
  func.func @transform_4(%arg0: i32) -> (i32, i32) {
    %c0_i32 = arith.constant 0 : i32
    %c0_i32_0 = arith.constant 0 : i32
    %c0_i32_1 = arith.constant 0 : i32
    return %c0_i32, %c0_i32_0 : i32, i32
  }
  func.func @transform_5(%arg0: i32) -> (i32, i32) {
    %c0_i32 = arith.constant 0 : i32
    %c0_i32_0 = arith.constant 0 : i32
    %c0_i32_1 = arith.constant 0 : i32
    return %c0_i32, %c0_i32_0 : i32, i32
  }
  func.func @transform_6(%arg0: i32) -> (i32, i32) {
    %c0_i32 = arith.constant 0 : i32
    %c0_i32_0 = arith.constant 0 : i32
    %c0_i32_1 = arith.constant 0 : i32
    return %c0_i32, %c0_i32_0 : i32, i32
  }
  func.func @transform_7(%arg0: i32) -> (i32, i32) {
    %c0_i32 = arith.constant 0 : i32
    %c0_i32_0 = arith.constant 0 : i32
    return %arg0, %c0_i32 : i32, i32
  }
}

</mosaic_0001>

<bundles_post_ra>
// kernel: simple_convnet_forward.1
= control target key start
LH: loop header
LB: loop body
LE: loop exit
PB: predicated region body
PF: predicated region fallthrough
CT: control target
= control target key end

     0   :  { %v2505_v7 = vmov 0.0   ;;  %s4396_s0 = inlined_call_operand.vmem [shape: f32[2,16,384], index: 0, kind: input, shape index: {}]   ;;  %s4397_s1 = inlined_call_operand.vmem [shape: f32[384,256], index: 1, kind: input, shape index: {}]   ;;  %s4398_s2 = inlined_call_operand.vmem [shape: f32[1,256], index: 2, kind: input, shape index: {}]   ;;  %s4399_s3 = inlined_call_operand.vmem [shape: f32[768,512], index: 3, kind: input, shape index: {}]   ;;  %s4400_s4 = inlined_call_operand.vmem [shape: f32[1,512], index: 4, kind: input, shape index: {}]   ;;  %s4401_s5 = inlined_call_operand.vmem [shape: f32[512,10], index: 5, kind: input, shape index: {}]   ;;  %s4402_s6 = inlined_call_operand.vmem [shape: f32[1,10], index: 6, kind: input, shape index: {}]   ;;  %s4403_s7 = inlined_call_operand.hbm [shape: f32[2,10], index: 7, kind: output, shape index: {}]  }
   0x1   :  { %v40_v0 = vld [vmem:[%s4397_s1 + $0x8] sm:$0xff]  ;;  %v42_v1 = vld [vmem:[%s4397_s1 + $0x18] sm:$0xff]  ;;  %v39_v2 = vld [vmem:[%s4397_s1] sm:$0xff]  ;;  %300 = vmatprep.mubr.f32.mxu1 %v2505_v7 }
   0x2   :  { %v1871_v3 = vpack.c.bf16 %v42_v1, %v40_v0  ;;  %v41_v4 = vld [vmem:[%s4397_s1 + $0x10] sm:$0xff]  ;;  %v44_v5 = vld [vmem:[%s4397_s1 + $0x28] sm:$0xff]  ;;  %v46_v6 = vld [vmem:[%s4397_s1 + $0x38] sm:$0xff] }
   0x3   :  { %v1873_v8 = vpack.c.bf16 %v41_v4, %v39_v2  ;;  %v1875_v9 = vpack.c.bf16 %v46_v6, %v44_v5  ;;  %v43_v10 = vld [vmem:[%s4397_s1 + $0x20] sm:$0xff]  ;;  %v45_v11 = vld [vmem:[%s4397_s1 + $0x30] sm:$0xff]  ;;  %v48_v12 = vld [vmem:[%s4397_s1 + $0x48] sm:$0xff] }
   0x4   :  { %1872 = vmatprep.subr.bf16.mxu0 %v1871_v3  ;;  %v50_v13 = vld [vmem:[%s4397_s1 + $0x58] sm:$0xff]  ;;  %v1877_v14 = vpack.c.bf16 %v45_v11, %v43_v10  ;;  %v47_v16 = vld [vmem:[%s4397_s1 + $0x40] sm:$0xff]  ;;  %v49_v17 = vld [vmem:[%s4397_s1 + $0x50] sm:$0xff] }
   0x5   :  { %1874 = vmatpush1.bf16.msra.mxu0 %v1873_v8  ;;  %v1879_v15 = vpack.c.bf16 %v50_v13, %v48_v12  ;;  %v52_v18 = vld [vmem:[%s4397_s1 + $0x68] sm:$0xff]  ;;  %v54_v19 = vld [vmem:[%s4397_s1 + $0x78] sm:$0xff]  ;;  %v1881_v20 = vpack.c.bf16 %v49_v17, %v47_v16  ;;  %v51_v22 = vld [vmem:[%s4397_s1 + $0x60] sm:$0xff] }
   0x6   :  { %1876 = vmatprep.subr.bf16.mxu0 %v1875_v9  ;;  %v1883_v21 = vpack.c.bf16 %v54_v19, %v52_v18  ;;  %v53_v23 = vld [vmem:[%s4397_s1 + $0x70] sm:$0xff]  ;;  %v56_v24 = vld [vmem:[%s4397_s1 + $0x88] sm:$0xff]  ;;  %v58_v25 = vld [vmem:[%s4397_s1 + $0x98] sm:$0xff] }
   0x7   :  { %v1885_v26 = vpack.c.bf16 %v53_v23, %v51_v22  ;;  %v104_v27 = vld [vmem:[%s4397_s1 + $0x208] sm:$0xff]  ;;  %v106_v28 = vld [vmem:[%s4397_s1 + $0x218] sm:$0xff]  ;;  %v103_v29 = vld [vmem:[%s4397_s1 + $0x200] sm:$0xff]  ;;  %v1887_v30 = vpack.c.bf16 %v58_v25, %v56_v24 }
   0x8   :  { %v55_v31 = vld [vmem:[%s4397_s1 + $0x80] sm:$0xff]  ;;  %v57_v32 = vld [vmem:[%s4397_s1 + $0x90] sm:$0xff]  ;;  %v1935_v33 = vpack.c.bf16 %v106_v28, %v104_v27  ;;  %v60_v35 = vld [vmem:[%s4397_s1 + $0xa8] sm:$0xff] }
   0x9   :  { %1878 = vmatpush1.bf16.msra.mxu0 %v1877_v14  ;;  %v105_v34 = vld [vmem:[%s4397_s1 + $0x210] sm:$0xff]  ;;  %v62_v36 = vld [vmem:[%s4397_s1 + $0xb8] sm:$0xff]  ;;  %v108_v38 = vld [vmem:[%s4397_s1 + $0x228] sm:$0xff]  ;;  %v1889_v42 = vpack.c.bf16 %v57_v32, %v55_v31 }
   0xa   :  { %1880 = vmatprep.subr.bf16.mxu0 %v1879_v15  ;;  %v1937_v37 = vpack.c.bf16 %v105_v34, %v103_v29  ;;  %1936 = vmatprep.subr.bf16.mxu1 %v1935_v33  ;;  %v110_v39 = vld [vmem:[%s4397_s1 + $0x238] sm:$0xff]  ;;  %v107_v40 = vld [vmem:[%s4397_s1 + $0x220] sm:$0xff]  ;;  %v109_v41 = vld [vmem:[%s4397_s1 + $0x230] sm:$0xff]  ;;  %v1891_v47 = vpack.c.bf16 %v62_v36, %v60_v35 }
   0xb   :  { %v59_v43 = vld [vmem:[%s4397_s1 + $0xa0] sm:$0xff]  ;;  %v61_v44 = vld [vmem:[%s4397_s1 + $0xb0] sm:$0xff]  ;;  %v1939_v45 = vpack.c.bf16 %v110_v39, %v108_v38  ;;  %v1941_v46 = vpack.c.bf16 %v109_v41, %v107_v40  ;;  %v64_v48 = vld [vmem:[%s4397_s1 + $0xc8] sm:$0xff] }
   0xc   :  { %1938 = vmatpush1.bf16.msra.mxu1 %v1937_v37  ;;  %v112_v49 = vld [vmem:[%s4397_s1 + $0x248] sm:$0xff]  ;;  %v114_v50 = vld [vmem:[%s4397_s1 + $0x258] sm:$0xff]  ;;  %v111_v53 = vld [vmem:[%s4397_s1 + $0x240] sm:$0xff]  ;;  %v1893_v55 = vpack.c.bf16 %v61_v44, %v59_v43 }
   0xd   :  { %1882 = vmatpush1.bf16.msra.mxu0 %v1881_v20  ;;  %v66_v51 = vld [vmem:[%s4397_s1 + $0xd8] sm:$0xff]  ;;  %1940 = vmatprep.subr.bf16.mxu1 %v1939_v45  ;;  %v1943_v52 = vpack.c.bf16 %v114_v50, %v112_v49  ;;  %v113_v54 = vld [vmem:[%s4397_s1 + $0x250] sm:$0xff]  ;;  %v63_v56 = vld [vmem:[%s4397_s1 + $0xc0] sm:$0xff] }
   0xe   :  { %1884 = vmatprep.subr.bf16.mxu0 %v1883_v21  ;;  %v1945_v57 = vpack.c.bf16 %v113_v54, %v111_v53  ;;  %v116_v58 = vld [vmem:[%s4397_s1 + $0x268] sm:$0xff]  ;;  %v118_v59 = vld [vmem:[%s4397_s1 + $0x278] sm:$0xff]  ;;  %v1895_v60 = vpack.c.bf16 %v66_v51, %v64_v48  ;;  %v65_v61 = vld [vmem:[%s4397_s1 + $0xd0] sm:$0xff] }
   0xf   :  { %v1947_v62 = vpack.c.bf16 %v118_v59, %v116_v58  ;;  %v115_v63 = vld [vmem:[%s4397_s1 + $0x260] sm:$0xff]  ;;  %v117_v0 = vld [vmem:[%s4397_s1 + $0x270] sm:$0xff]  ;;  %v68_v1 = vld [vmem:[%s4397_s1 + $0xe8] sm:$0xff]  ;;  %v1897_v5 = vpack.c.bf16 %v65_v61, %v63_v56 }
  0x10   :  { %1942 = vmatpush1.bf16.msra.mxu1 %v1941_v46  ;;  %v70_v2 = vld [vmem:[%s4397_s1 + $0xf8] sm:$0xff]  ;;  %v120_v3 = vld [vmem:[%s4397_s1 + $0x288] sm:$0xff]  ;;  %v67_v6 = vld [vmem:[%s4397_s1 + $0xe0] sm:$0xff]  ;;  %v1949_v9 = vpack.c.bf16 %v117_v0, %v115_v63 }
  0x11   :  { %1886 = vmatpush1.bf16.msra.mxu0 %v1885_v26  ;;  %1944 = vmatprep.subr.bf16.mxu1 %v1943_v52  ;;  %v122_v4 = vld [vmem:[%s4397_s1 + $0x298] sm:$0xff]  ;;  %v69_v8 = vld [vmem:[%s4397_s1 + $0xf0] sm:$0xff]  ;;  %v1899_v10 = vpack.c.bf16 %v70_v2, %v68_v1  ;;  %v72_v11 = vld [vmem:[%s4397_s1 + $0x108] sm:$0xff] }
  0x12   :  { %1888 = vmatprep.subr.bf16.mxu0 %v1887_v30  ;;  %v1951_v12 = vpack.c.bf16 %v122_v4, %v120_v3  ;;  %v119_v13 = vld [vmem:[%s4397_s1 + $0x280] sm:$0xff]  ;;  %v121_v14 = vld [vmem:[%s4397_s1 + $0x290] sm:$0xff]  ;;  %v74_v15 = vld [vmem:[%s4397_s1 + $0x118] sm:$0xff]  ;;  %v1901_v18 = vpack.c.bf16 %v69_v8, %v67_v6 }
  0x13   :  { %v124_v16 = vld [vmem:[%s4397_s1 + $0x2a8] sm:$0xff]  ;;  %v126_v17 = vld [vmem:[%s4397_s1 + $0x2b8] sm:$0xff]  ;;  %v71_v19 = vld [vmem:[%s4397_s1 + $0x100] sm:$0xff]  ;;  %v1953_v21 = vpack.c.bf16 %v121_v14, %v119_v13  ;;  %v1903_v22 = vpack.c.bf16 %v74_v15, %v72_v11 }
  0x14   :  { %1946 = vmatpush1.bf16.msra.mxu1 %v1945_v57  ;;  %v73_v20 = vld [vmem:[%s4397_s1 + $0x110] sm:$0xff]  ;;  %v76_v23 = vld [vmem:[%s4397_s1 + $0x128] sm:$0xff]  ;;  %v1955_v24 = vpack.c.bf16 %v126_v17, %v124_v16  ;;  %v123_v25 = vld [vmem:[%s4397_s1 + $0x2a0] sm:$0xff] }
  0x15   :  { %1890 = vmatpush1.bf16.msra.mxu0 %v1889_v42  ;;  %1948 = vmatprep.subr.bf16.mxu1 %v1947_v62  ;;  %v125_v26 = vld [vmem:[%s4397_s1 + $0x2b0] sm:$0xff]  ;;  %v78_v27 = vld [vmem:[%s4397_s1 + $0x138] sm:$0xff]  ;;  %v128_v28 = vld [vmem:[%s4397_s1 + $0x2c8] sm:$0xff]  ;;  %v1905_v30 = vpack.c.bf16 %v73_v20, %v71_v19 }
  0x16   :  { %1892 = vmatprep.subr.bf16.mxu0 %v1891_v47  ;;  %v130_v29 = vld [vmem:[%s4397_s1 + $0x2d8] sm:$0xff]  ;;  %v75_v31 = vld [vmem:[%s4397_s1 + $0x120] sm:$0xff]  ;;  %v77_v32 = vld [vmem:[%s4397_s1 + $0x130] sm:$0xff]  ;;  %v1957_v33 = vpack.c.bf16 %v125_v26, %v123_v25  ;;  %v1907_v35 = vpack.c.bf16 %v78_v27, %v76_v23 }
  0x17   :  { %v28_v34 = vld [vmem:[%s4396_s0 + $0x8] sm:$0xff]  ;;  %v1959_v37 = vpack.c.bf16 %v130_v29, %v128_v28  ;;  %v127_v38 = vld [vmem:[%s4397_s1 + $0x2c0] sm:$0xff]  ;;  %v129_v39 = vld [vmem:[%s4397_s1 + $0x2d0] sm:$0xff]  ;;  %v1909_v43 = vpack.c.bf16 %v77_v32, %v75_v31 }
  0x18   :  { %1950 = vmatpush1.bf16.msra.mxu1 %v1949_v9  ;;  %v80_v36 = vld [vmem:[%s4397_s1 + $0x148] sm:$0xff]  ;;  %v82_v40 = vld [vmem:[%s4397_s1 + $0x158] sm:$0xff]  ;;  %211 = vmatprep.mubr.f32.mxu0 %v28_v34  ;;  %v79_v44 = vld [vmem:[%s4397_s1 + $0x140] sm:$0xff]  ;;  %v1961_v46 = vpack.c.bf16 %v129_v39, %v127_v38 }
  0x19   :  { %1894 = vmatpush1.bf16.msra.mxu0 %v1893_v55  ;;  %1952 = vmatprep.subr.bf16.mxu1 %v1951_v12  ;;  %v132_v41 = vld [vmem:[%s4397_s1 + $0x2e8] sm:$0xff]  ;;  %v134_v42 = vld [vmem:[%s4397_s1 + $0x2f8] sm:$0xff]  ;;  %v81_v45 = vld [vmem:[%s4397_s1 + $0x150] sm:$0xff]  ;;  %v1911_v47 = vpack.c.bf16 %v82_v40, %v80_v36 }
  0x1a   :  { %1896 = vmatprep.subr.bf16.mxu0 %v1895_v60  ;;  %v84_v48 = vld [vmem:[%s4397_s1 + $0x168] sm:$0xff]  ;;  %v1963_v49 = vpack.c.bf16 %v134_v42, %v132_v41  ;;  %v131_v50 = vld [vmem:[%s4397_s1 + $0x2e0] sm:$0xff]  ;;  %v133_v51 = vld [vmem:[%s4397_s1 + $0x2f0] sm:$0xff]  ;;  %v1913_v55 = vpack.c.bf16 %v81_v45, %v79_v44 }
  0x1b   :  { %v86_v52 = vld [vmem:[%s4397_s1 + $0x178] sm:$0xff]  ;;  %v509_v53 = vld [vmem:[%s4399_s3 + $0x8] sm:$0xff]  ;;  %v1965_v56 = vpack.c.bf16 %v133_v51, %v131_v50  ;;  %v83_v58 = vld [vmem:[%s4397_s1 + $0x160] sm:$0xff] }
  0x1c   :  { %1954 = vmatpush1.bf16.msra.mxu1 %v1953_v21  ;;  %v513_v54 = vld [vmem:[%s4399_s3 + $0x28] sm:$0xff]  ;;  %v1915_v57 = vpack.c.bf16 %v86_v52, %v84_v48  ;;  %v85_v59 = vld [vmem:[%s4397_s1 + $0x170] sm:$0xff]  ;;  %v90_v62 = vld [vmem:[%s4397_s1 + $0x198] sm:$0xff] }
  0x1d   :  { %1898 = vmatpush1.bf16.msra.mxu0 %v1897_v5  ;;  %1956 = vmatprep.subr.bf16.mxu1 %v1955_v24  ;;  %v88_v60 = vld [vmem:[%s4397_s1 + $0x188] sm:$0xff]  ;;  %v1967_v61 = vpack.c.bf16 %v513_v54, %v509_v53  ;;  %v508_v63 = vld [vmem:[%s4399_s3] sm:$0xff]  ;;  %v1917_v3 = vpack.c.bf16 %v85_v59, %v83_v58  ;;  %v29_v4 = vld [vmem:[%s4396_s0 + $0x10] sm:$0xff] }
  0x1e   :  { %1900 = vmatprep.subr.bf16.mxu0 %v1899_v10  ;;  %v512_v0 = vld [vmem:[%s4399_s3 + $0x20] sm:$0xff]  ;;  %v517_v1 = vld [vmem:[%s4399_s3 + $0x48] sm:$0xff]  ;;  %v1919_v5 = vpack.c.bf16 %v90_v62, %v88_v60  ;;  %v89_v8 = vld [vmem:[%s4397_s1 + $0x190] sm:$0xff] }
  0x1f   :  { %v521_v2 = vld [vmem:[%s4399_s3 + $0x68] sm:$0xff]  ;;  %v87_v6 = vld [vmem:[%s4397_s1 + $0x180] sm:$0xff]  ;;  %v1969_v10 = vpack.c.bf16 %v512_v0, %v508_v63  ;;  %v94_v11 = vld [vmem:[%s4397_s1 + $0x1b8] sm:$0xff] }
  0x20   :  { %1958 = vmatpush1.bf16.msra.mxu1 %v1957_v33  ;;  %v92_v9 = vld [vmem:[%s4397_s1 + $0x1a8] sm:$0xff]  ;;  %v1971_v12 = vpack.c.bf16 %v521_v2, %v517_v1  ;;  %v516_v13 = vld [vmem:[%s4399_s3 + $0x40] sm:$0xff]  ;;  %v1921_v17 = vpack.c.bf16 %v89_v8, %v87_v6  ;;  %v93_v21 = vld [vmem:[%s4397_s1 + $0x1b0] sm:$0xff] }
  0x21   :  { %1902 = vmatpush1.bf16.msra.mxu0 %v1901_v18  ;;  %1960 = vmatprep.subr.bf16.mxu1 %v1959_v37  ;;  %v520_v14 = vld [vmem:[%s4399_s3 + $0x60] sm:$0xff]  ;;  %v525_v15 = vld [vmem:[%s4399_s3 + $0x88] sm:$0xff]  ;;  %v1923_v19 = vpack.c.bf16 %v94_v11, %v92_v9  ;;  %v98_v24 = vld [vmem:[%s4397_s1 + $0x1d8] sm:$0xff] }
  0x22   :  { %1904 = vmatprep.subr.bf16.mxu0 %v1903_v22  ;;  %v529_v16 = vld [vmem:[%s4399_s3 + $0xa8] sm:$0xff]  ;;  %v91_v20 = vld [vmem:[%s4397_s1 + $0x1a0] sm:$0xff]  ;;  %v1973_v23 = vpack.c.bf16 %v520_v14, %v516_v13  ;;  %v97_v34 = vld [vmem:[%s4397_s1 + $0x1d0] sm:$0xff] }
  0x23   :  { %v32_v18 = vld [vmem:[%s4396_s0 + $0x28] sm:$0xff]  ;;  %v1975_v25 = vpack.c.bf16 %v529_v16, %v525_v15  ;;  %v524_v26 = vld [vmem:[%s4399_s3 + $0x80] sm:$0xff]  ;;  %v102_v37 = vld [vmem:[%s4397_s1 + $0x1f8] sm:$0xff] }
  0x24   :  { %1962 = vmatpush1.bf16.msra.mxu1 %v1961_v46  ;;  %v96_v22 = vld [vmem:[%s4397_s1 + $0x1c8] sm:$0xff]  ;;  %v528_v27 = vld [vmem:[%s4399_s3 + $0xa0] sm:$0xff]  ;;  %v38_v44 = vld [vmem:[%s4396_s0 + $0x58] sm:$0xff] }
  0x25   :  { %1906 = vmatpush1.bf16.msra.mxu0 %v1905_v30  ;;  %1964 = vmatprep.subr.bf16.mxu1 %v1963_v49  ;;  %v533_v28 = vld [vmem:[%s4399_s3 + $0xc8] sm:$0xff]  ;;  %v1925_v30 = vpack.c.bf16 %v93_v21, %v91_v20  ;;  %v35_v31 = vld [vmem:[%s4396_s0 + $0x40] sm:$0xff]  ;;  %v1927_v32 = vpack.c.bf16 %v98_v24, %v96_v22  ;;  %v1977_v36 = vpack.c.bf16 %v528_v27, %v524_v26  ;;  %v511_v48 = vld [vmem:[%s4399_s3 + $0x18] sm:$0xff] }
  0x26   :  { %1908 = vmatprep.subr.bf16.mxu0 %v1907_v35  ;;  %v537_v29 = vld [vmem:[%s4399_s3 + $0xe8] sm:$0xff]  ;;  %v95_v33 = vld [vmem:[%s4397_s1 + $0x1c0] sm:$0xff]  ;;  %v515_v49 = vld [vmem:[%s4399_s3 + $0x38] sm:$0xff] }
  0x27   :  { %v100_v35 = vld [vmem:[%s4397_s1 + $0x1e8] sm:$0xff]  ;;  %v1979_v38 = vpack.c.bf16 %v537_v29, %v533_v28  ;;  %v532_v39 = vld [vmem:[%s4399_s3 + $0xc0] sm:$0xff]  ;;  %v514_v58 = vld [vmem:[%s4399_s3 + $0x30] sm:$0xff] }
  0x28   :  { %1966 = vmatpush1.bf16.msra.mxu1 %v1965_v56  ;;  %v536_v40 = vld [vmem:[%s4399_s3 + $0xe0] sm:$0xff]  ;;  %v541_v41 = vld [vmem:[%s4399_s3 + $0x108] sm:$0xff]  ;;  %v1931_v45 = vpack.c.bf16 %v102_v37, %v100_v35  ;;  %v2159_v56 = vpack.c.bf16 %v515_v49, %v511_v48  ;;  %v519_v59 = vld [vmem:[%s4399_s3 + $0x58] sm:$0xff] }
  0x29   :  { %1910 = vmatpush1.bf16.msra.mxu0 %v1909_v43  ;;  %1968 = vmatprep.subr.bf16.mxu1 %v1967_v61  ;;  %v545_v42 = vld [vmem:[%s4399_s3 + $0x128] sm:$0xff]  ;;  %v1929_v43 = vpack.c.bf16 %v97_v34, %v95_v33  ;;  %v99_v46 = vld [vmem:[%s4397_s1 + $0x1e0] sm:$0xff]  ;;  %v523_v61 = vld [vmem:[%s4399_s3 + $0x78] sm:$0xff] }
  0x2a   :  { %1912 = vmatprep.subr.bf16.mxu0 %v1911_v47  ;;  %v101_v47 = vld [vmem:[%s4397_s1 + $0x1f0] sm:$0xff]  ;;  %v1983_v50 = vpack.c.bf16 %v545_v42, %v541_v41  ;;  %v540_v51 = vld [vmem:[%s4399_s3 + $0x100] sm:$0xff]  ;;  %v549_v53 = vld [vmem:[%s4399_s3 + $0x148] sm:$0xff]  ;;  %v2163_v6 = vpack.c.bf16 %v523_v61, %v519_v59 }
  0x2b   :  { %301 = vmatmul.mubr.f32.vlgmr.msra.gmra.mrb[0].mxu1 %v29_v4  ;;  %v544_v52 = vld [vmem:[%s4399_s3 + $0x120] sm:$0xff]  ;;  %v553_v54 = vld [vmem:[%s4399_s3 + $0x168] sm:$0xff]  ;;  %v518_v8 = vld [vmem:[%s4399_s3 + $0x50] sm:$0xff] }
  0x2c   :  { %306 = vmatprep.mubr.f32.mxu1 %v2505_v7  ;;  %1970 = vmatpush1.bf16.msra.mxu1 %v1969_v10  ;;  %v1985_v60 = vpack.c.bf16 %v544_v52, %v540_v51  ;;  %v1987_v62 = vpack.c.bf16 %v553_v54, %v549_v53  ;;  %v548_v63 = vld [vmem:[%s4399_s3 + $0x140] sm:$0xff]  ;;  %v557_v1 = vld [vmem:[%s4399_s3 + $0x188] sm:$0xff]  ;;  %v522_v9 = vld [vmem:[%s4399_s3 + $0x70] sm:$0xff] }
  0x2d   :  { %1914 = vmatpush1.bf16.msra.mxu0 %v1913_v55  ;;  %1972 = vmatprep.subr.bf16.mxu1 %v1971_v12  ;;  %v1933_v55 = vpack.c.bf16 %v101_v47, %v99_v46  ;;  %v552_v0 = vld [vmem:[%s4399_s3 + $0x160] sm:$0xff]  ;;  %v561_v2 = vld [vmem:[%s4399_s3 + $0x1a8] sm:$0xff]  ;;  %v527_v10 = vld [vmem:[%s4399_s3 + $0x98] sm:$0xff] }
  0x2e   :  { %1916 = vmatprep.subr.bf16.mxu0 %v1915_v57  ;;  %v510_v57 = vld [vmem:[%s4399_s3 + $0x10] sm:$0xff]  ;;  %v31_v4 = vld [vmem:[%s4396_s0 + $0x20] sm:$0xff]  ;;  %v1989_v11 = vpack.c.bf16 %v552_v0, %v548_v63  ;;  %v531_v12 = vld [vmem:[%s4399_s3 + $0xb8] sm:$0xff]  ;;  %v1991_v13 = vpack.c.bf16 %v561_v2, %v557_v1 }
  0x2f   :  { %307 = vmatmul.mubr.f32.gmra.mrb[2].mxu1 %v32_v18  ;;  %v556_v14 = vld [vmem:[%s4399_s3 + $0x180] sm:$0xff]  ;;  %v565_v16 = vld [vmem:[%s4399_s3 + $0x1c8] sm:$0xff] }
  0x30   :  { %312 = vmatprep.mubr.f32.mxu1 %v2505_v7  ;;  %1974 = vmatpush1.bf16.msra.mxu1 %v1973_v23  ;;  %v560_v15 = vld [vmem:[%s4399_s3 + $0x1a0] sm:$0xff] }
  0x31   :  { %1918 = vmatpush1.bf16.msra.mxu0 %v1917_v3  ;;  %1976 = vmatprep.subr.bf16.mxu1 %v1975_v25  ;;  %v27_v3 = vld [vmem:[%s4396_s0] sm:$0xff] }
  0x32   :  { %1920 = vmatprep.subr.bf16.mxu0 %v1919_v5  ;;  %v2161_v5 = vpack.c.bf16 %v514_v58, %v510_v57 }
  0x33   :  { %313 = vmatmul.mubr.f32.gmra.mrb[4].mxu1 %v35_v31 }
  0x34   :  { %318 = vmatprep.mubr.f32.mxu1 %v2505_v7  ;;  %1978 = vmatpush1.bf16.msra.mxu1 %v1977_v36  ;;  %v1981_v7 = vpack.c.bf16 %v536_v40, %v532_v39 }
  0x35   :  { %1922 = vmatpush1.bf16.msra.mxu0 %v1921_v17  ;;  %1980 = vmatprep.subr.bf16.mxu1 %v1979_v38  ;;  %v569_v17 = vld [vmem:[%s4399_s3 + $0x1e8] sm:$0xff] }
  0x36   :  { %1924 = vmatprep.subr.bf16.mxu0 %v1923_v19 }
  0x37   :  { %319 = vmatmul.mubr.f32.gmra.mrb[6].mxu1 %v38_v44 }
  0x38   :  { %1982 = vmatpush1.bf16.msra.mxu1 %v1981_v7 }
  0x39   :  { %1926 = vmatpush1.bf16.msra.mxu0 %v1925_v30  ;;  %1984 = vmatprep.subr.bf16.mxu1 %v1983_v50 }
  0x3a   :  { %1928 = vmatprep.subr.bf16.mxu0 %v1927_v32 }
  0x3c   :  { %1986 = vmatpush1.bf16.msra.mxu1 %v1985_v60 }
  0x3d   :  { %1930 = vmatpush1.bf16.msra.mxu0 %v1929_v43  ;;  %1988 = vmatprep.subr.bf16.mxu1 %v1987_v62 }
  0x3e   :  { %1932 = vmatprep.subr.bf16.mxu0 %v1931_v45 }
  0x41   :  { %1934 = vmatpush1.bf16.msra.mxu0 %v1933_v55 }
  0x42   :  { %2160 = vmatprep.subr.bf16.mxu0 %v2159_v56 }
  0x44   :  { %212 = vmatmul.mubr.f32.vlgmr.msra.gmra.mrb[0].mxu0 %v27_v3 }
  0x45   :  { %12 = vsyncpa [#allocation4], 0  ;;  %217 = vmatprep.mubr.f32.mxu0 %v31_v4  ;;  %v30_v18 = vld [vmem:[%s4396_s0 + $0x18] sm:$0xff]  ;;  %2162 = vmatpush1.bf16.msra.mxu0 %v2161_v5  ;;  %v2165_v20 = vpack.c.bf16 %v522_v9, %v518_v8  ;;  %v2167_v21 = vpack.c.bf16 %v531_v12, %v527_v10  ;;  %v526_v22 = vld [vmem:[%s4399_s3 + $0x90] sm:$0xff]  ;;  %v1993_v25 = vpack.c.bf16 %v560_v15, %v556_v14  ;;  %vm416_vm0 = vcmask 1040384  }
  0x46   :  { %v34_v19 = vld [vmem:[%s4396_s0 + $0x38] sm:$0xff]  ;;  %2164 = vmatprep.subr.bf16.mxu0 %v2163_v6  ;;  %v530_v23 = vld [vmem:[%s4399_s3 + $0xb0] sm:$0xff]  ;;  %1990 = vmatpush1.bf16.msra.mxu1 %v1989_v11  ;;  %v1995_v27 = vpack.c.bf16 %v569_v17, %v565_v16  ;;  %v564_v28 = vld [vmem:[%s4399_s3 + $0x1c0] sm:$0xff]  ;;  %vm473_vm3 = vcmask 1046528   ;;  %vm1599_vm6 = vcmask 1041409   ;;  %vm1748_vm7 = vcmask 74752  }
  0x47   :  { %v535_v24 = vld [vmem:[%s4399_s3 + $0xd8] sm:$0xff]  ;;  %1992 = vmatprep.subr.bf16.mxu1 %v1991_v13  ;;  %v568_v29 = vld [vmem:[%s4399_s3 + $0x1e0] sm:$0xff]  ;;  %v573_v30 = vld [vmem:[%s4399_s3 + $0x208] sm:$0xff]  ;;  %v2169_v34 = vpack.c.bf16 %v530_v23, %v526_v22 }
  0x48   :  { %v539_v26 = vld [vmem:[%s4399_s3 + $0xf8] sm:$0xff]  ;;  %218 = vmatmul.mubr.f32.gmra.mrb[2].mxu0 %v30_v18  ;;  %v577_v31 = vld [vmem:[%s4399_s3 + $0x228] sm:$0xff]  ;;  %v33_v32 = vld [vmem:[%s4396_s0 + $0x30] sm:$0xff]  ;;  %v1997_v39 = vpack.c.bf16 %v568_v29, %v564_v28 }
  0x49   :  { %223 = vmatprep.mubr.f32.mxu0 %v34_v19  ;;  %v37_v33 = vld [vmem:[%s4396_s0 + $0x50] sm:$0xff]  ;;  %2166 = vmatpush1.bf16.msra.mxu0 %v2165_v20  ;;  %v2171_v35 = vpack.c.bf16 %v539_v26, %v535_v24  ;;  %v543_v38 = vld [vmem:[%s4399_s3 + $0x118] sm:$0xff]  ;;  %v1999_v41 = vpack.c.bf16 %v577_v31, %v573_v30  ;;  %v572_v42 = vld [vmem:[%s4399_s3 + $0x200] sm:$0xff] }
  0x4a   :  { %2168 = vmatprep.subr.bf16.mxu0 %v2167_v21  ;;  %v534_v36 = vld [vmem:[%s4399_s3 + $0xd0] sm:$0xff]  ;;  %1994 = vmatpush1.bf16.msra.mxu1 %v1993_v25  ;;  %v547_v40 = vld [vmem:[%s4399_s3 + $0x138] sm:$0xff]  ;;  %v576_v43 = vld [vmem:[%s4399_s3 + $0x220] sm:$0xff] }
  0x4b   :  { %v538_v37 = vld [vmem:[%s4399_s3 + $0xf0] sm:$0xff]  ;;  %1996 = vmatprep.subr.bf16.mxu1 %v1995_v27  ;;  %v581_v44 = vld [vmem:[%s4399_s3 + $0x248] sm:$0xff]  ;;  %v2175_v48 = vpack.c.bf16 %v547_v40, %v543_v38  ;;  %v551_v50 = vld [vmem:[%s4399_s3 + $0x158] sm:$0xff]  ;;  %v2001_v51 = vpack.c.bf16 %v576_v43, %v572_v42 }
  0x4c   :  { %224 = vmatmul.mubr.f32.gmra.mrb[4].mxu0 %v33_v32  ;;  %v585_v45 = vld [vmem:[%s4399_s3 + $0x268] sm:$0xff]  ;;  %v2173_v47 = vpack.c.bf16 %v538_v37, %v534_v36  ;;  %v542_v7 = vld [vmem:[%s4399_s3 + $0x110] sm:$0xff]  ;;  %v555_v52 = vld [vmem:[%s4399_s3 + $0x178] sm:$0xff] }
  0x4d   :  { %229 = vmatprep.mubr.f32.mxu0 %v37_v33  ;;  %v36_v46 = vld [vmem:[%s4396_s0 + $0x48] sm:$0xff]  ;;  %2170 = vmatpush1.bf16.msra.mxu0 %v2169_v34  ;;  %v546_v49 = vld [vmem:[%s4399_s3 + $0x130] sm:$0xff]  ;;  %v2003_v53 = vpack.c.bf16 %v585_v45, %v581_v44  ;;  %v580_v54 = vld [vmem:[%s4399_s3 + $0x240] sm:$0xff]  ;;  %v2179_v59 = vpack.c.bf16 %v555_v52, %v551_v50  ;;  %s2506_s0 = smov [#allocation3]  }
  0x4e   :  { %2172 = vmatprep.subr.bf16.mxu0 %v2171_v35  ;;  %1998 = vmatpush1.bf16.msra.mxu1 %v1997_v39  ;;  %v584_v55 = vld [vmem:[%s4399_s3 + $0x260] sm:$0xff]  ;;  %v589_v56 = vld [vmem:[%s4399_s3 + $0x288] sm:$0xff]  ;;  %v2177_v58 = vpack.c.bf16 %v546_v49, %v542_v7  ;;  %v550_v60 = vld [vmem:[%s4399_s3 + $0x150] sm:$0xff]  ;;  %s1756_s10 = sshll.u32 %s2506_s0, 4  ;;  %s1757_s10 = int_to_ptr.vmem [resolvable:$true] %s1756_s10 }
  0x4f   :  { %2000 = vmatprep.subr.bf16.mxu1 %v1999_v41  ;;  %v593_v57 = vld [vmem:[%s4399_s3 + $0x2a8] sm:$0xff]  ;;  %v554_v61 = vld [vmem:[%s4399_s3 + $0x170] sm:$0xff]  ;;  %v559_v62 = vld [vmem:[%s4399_s3 + $0x198] sm:$0xff]  ;;  %v2005_v63 = vpack.c.bf16 %v584_v55, %v580_v54  ;;  %p2486_p1 = scmp.lt.s32.totalorder %s1757_s10, %s1757_s10 }
  0x50   :  { %230 = vmatmul.mubr.f32.gmra.mrb[6].mxu0 %v36_v46  ;;  %v563_v0 = vld [vmem:[%s4399_s3 + $0x1b8] sm:$0xff]  ;;  %v2007_v1 = vpack.c.bf16 %v593_v57, %v589_v56  ;;  %v588_v2 = vld [vmem:[%s4399_s3 + $0x280] sm:$0xff]  ;;  %v597_v4 = vld [vmem:[%s4399_s3 + $0x2c8] sm:$0xff]  ;;  %v2181_v6 = vpack.c.bf16 %v554_v61, %v550_v60 }
  0x51   :  { %2174 = vmatpush1.bf16.msra.mxu0 %v2173_v47  ;;  %v592_v3 = vld [vmem:[%s4399_s3 + $0x2a0] sm:$0xff]  ;;  %v601_v5 = vld [vmem:[%s4399_s3 + $0x2e8] sm:$0xff]  ;;  %v2183_v8 = vpack.c.bf16 %v563_v0, %v559_v62  ;;  %v558_v9 = vld [vmem:[%s4399_s3 + $0x190] sm:$0xff] }
  0x52   :  { %2176 = vmatprep.subr.bf16.mxu0 %v2175_v48  ;;  %2002 = vmatpush1.bf16.msra.mxu1 %v2001_v51  ;;  %v562_v10 = vld [vmem:[%s4399_s3 + $0x1b0] sm:$0xff]  ;;  %v2009_v11 = vpack.c.bf16 %v592_v3, %v588_v2  ;;  %v567_v12 = vld [vmem:[%s4399_s3 + $0x1d8] sm:$0xff]  ;;  %v2011_v14 = vpack.c.bf16 %v601_v5, %v597_v4  ;;  %v596_v41 = vld [vmem:[%s4399_s3 + $0x2c0] sm:$0xff] }
  0x53   :  { %2004 = vmatprep.subr.bf16.mxu1 %v2003_v53  ;;  %v571_v13 = vld [vmem:[%s4399_s3 + $0x1f8] sm:$0xff]  ;;  %v2185_v15 = vpack.c.bf16 %v562_v10, %v558_v9  ;;  %v566_v17 = vld [vmem:[%s4399_s3 + $0x1d0] sm:$0xff]  ;;  %v600_v42 = vld [vmem:[%s4399_s3 + $0x2e0] sm:$0xff] }
  0x54   :  { %v2187_v16 = vpack.c.bf16 %v571_v13, %v567_v12  ;;  %v570_v18 = vld [vmem:[%s4399_s3 + $0x1f0] sm:$0xff]  ;;  %v575_v19 = vld [vmem:[%s4399_s3 + $0x218] sm:$0xff]  ;;  %v2013_v44 = vpack.c.bf16 %v600_v42, %v596_v41  ;;  %v605_v47 = vld [vmem:[%s4399_s3 + $0x308] sm:$0xff] }
  0x55   :  { %2178 = vmatpush1.bf16.msra.mxu0 %v2177_v58  ;;  %v579_v20 = vld [vmem:[%s4399_s3 + $0x238] sm:$0xff]  ;;  %v2189_v21 = vpack.c.bf16 %v570_v18, %v566_v17  ;;  %v574_v23 = vld [vmem:[%s4399_s3 + $0x210] sm:$0xff]  ;;  %v609_v48 = vld [vmem:[%s4399_s3 + $0x328] sm:$0xff] }
  0x56   :  { %2180 = vmatprep.subr.bf16.mxu0 %v2179_v59  ;;  %2006 = vmatpush1.bf16.msra.mxu1 %v2005_v63  ;;  %v2191_v22 = vpack.c.bf16 %v579_v20, %v575_v19  ;;  %v578_v24 = vld [vmem:[%s4399_s3 + $0x230] sm:$0xff]  ;;  %v583_v25 = vld [vmem:[%s4399_s3 + $0x258] sm:$0xff]  ;;  %v2015_v49 = vpack.c.bf16 %v609_v48, %v605_v47  ;;  %v604_v51 = vld [vmem:[%s4399_s3 + $0x300] sm:$0xff] }
  0x57   :  { %2008 = vmatprep.subr.bf16.mxu1 %v2007_v1  ;;  %v587_v26 = vld [vmem:[%s4399_s3 + $0x278] sm:$0xff]  ;;  %v2193_v27 = vpack.c.bf16 %v578_v24, %v574_v23  ;;  %v582_v29 = vld [vmem:[%s4399_s3 + $0x250] sm:$0xff]  ;;  %v608_v52 = vld [vmem:[%s4399_s3 + $0x320] sm:$0xff] }
  0x58   :  { %v2195_v28 = vpack.c.bf16 %v587_v26, %v583_v25  ;;  %v586_v30 = vld [vmem:[%s4399_s3 + $0x270] sm:$0xff]  ;;  %v591_v31 = vld [vmem:[%s4399_s3 + $0x298] sm:$0xff]  ;;  %v2017_v54 = vpack.c.bf16 %v608_v52, %v604_v51  ;;  %v613_v58 = vld [vmem:[%s4399_s3 + $0x348] sm:$0xff] }
  0x59   :  { %2182 = vmatpush1.bf16.msra.mxu0 %v2181_v6  ;;  %v595_v32 = vld [vmem:[%s4399_s3 + $0x2b8] sm:$0xff]  ;;  %v2197_v33 = vpack.c.bf16 %v586_v30, %v582_v29  ;;  %v590_v35 = vld [vmem:[%s4399_s3 + $0x290] sm:$0xff]  ;;  %v617_v59 = vld [vmem:[%s4399_s3 + $0x368] sm:$0xff] }
  0x5a   :  { %2184 = vmatprep.subr.bf16.mxu0 %v2183_v8  ;;  %2010 = vmatpush1.bf16.msra.mxu1 %v2009_v11  ;;  %v2199_v34 = vpack.c.bf16 %v595_v32, %v591_v31  ;;  %v594_v36 = vld [vmem:[%s4399_s3 + $0x2b0] sm:$0xff]  ;;  %v599_v37 = vld [vmem:[%s4399_s3 + $0x2d8] sm:$0xff]  ;;  %v2019_v61 = vpack.c.bf16 %v617_v59, %v613_v58  ;;  %v612_v63 = vld [vmem:[%s4399_s3 + $0x340] sm:$0xff] }
  0x5b   :  { %2012 = vmatprep.subr.bf16.mxu1 %v2011_v14  ;;  %v603_v38 = vld [vmem:[%s4399_s3 + $0x2f8] sm:$0xff]  ;;  %v2201_v39 = vpack.c.bf16 %v594_v36, %v590_v35  ;;  %v598_v43 = vld [vmem:[%s4399_s3 + $0x2d0] sm:$0xff]  ;;  %v616_v0 = vld [vmem:[%s4399_s3 + $0x360] sm:$0xff] }
  0x5c   :  { %v2203_v40 = vpack.c.bf16 %v603_v38, %v599_v37  ;;  %v602_v45 = vld [vmem:[%s4399_s3 + $0x2f0] sm:$0xff]  ;;  %v607_v7 = vld [vmem:[%s4399_s3 + $0x318] sm:$0xff]  ;;  %v2021_v2 = vpack.c.bf16 %v616_v0, %v612_v63  ;;  %v621_v6 = vld [vmem:[%s4399_s3 + $0x388] sm:$0xff] }
  0x5d   :  { %2186 = vmatpush1.bf16.msra.mxu0 %v2185_v15  ;;  %v2205_v46 = vpack.c.bf16 %v602_v45, %v598_v43  ;;  %v611_v50 = vld [vmem:[%s4399_s3 + $0x338] sm:$0xff]  ;;  %v606_v55 = vld [vmem:[%s4399_s3 + $0x310] sm:$0xff]  ;;  %v625_v8 = vld [vmem:[%s4399_s3 + $0x3a8] sm:$0xff] }
  0x5e   :  { %2188 = vmatprep.subr.bf16.mxu0 %v2187_v16  ;;  %2014 = vmatpush1.bf16.msra.mxu1 %v2013_v44  ;;  %v2207_v53 = vpack.c.bf16 %v611_v50, %v607_v7  ;;  %v610_v56 = vld [vmem:[%s4399_s3 + $0x330] sm:$0xff]  ;;  %v615_v60 = vld [vmem:[%s4399_s3 + $0x358] sm:$0xff]  ;;  %v2023_v10 = vpack.c.bf16 %v625_v8, %v621_v6  ;;  %v620_v12 = vld [vmem:[%s4399_s3 + $0x380] sm:$0xff] }
  0x5f   :  { %2016 = vmatprep.subr.bf16.mxu1 %v2015_v49  ;;  %v2209_v57 = vpack.c.bf16 %v610_v56, %v606_v55  ;;  %v619_v62 = vld [vmem:[%s4399_s3 + $0x378] sm:$0xff]  ;;  %v614_v3 = vld [vmem:[%s4399_s3 + $0x350] sm:$0xff]  ;;  %v624_v13 = vld [vmem:[%s4399_s3 + $0x3a0] sm:$0xff] }
  0x60   :  { %v2211_v1 = vpack.c.bf16 %v619_v62, %v615_v60  ;;  %v618_v4 = vld [vmem:[%s4399_s3 + $0x370] sm:$0xff]  ;;  %v623_v9 = vld [vmem:[%s4399_s3 + $0x398] sm:$0xff]  ;;  %v2025_v15 = vpack.c.bf16 %v624_v13, %v620_v12  ;;  %v629_v19 = vld [vmem:[%s4399_s3 + $0x3c8] sm:$0xff] }
  0x61   :  { %2190 = vmatpush1.bf16.msra.mxu0 %v2189_v21  ;;  %v2213_v5 = vpack.c.bf16 %v618_v4, %v614_v3  ;;  %v627_v11 = vld [vmem:[%s4399_s3 + $0x3b8] sm:$0xff]  ;;  %v622_v16 = vld [vmem:[%s4399_s3 + $0x390] sm:$0xff]  ;;  %v633_v20 = vld [vmem:[%s4399_s3 + $0x3e8] sm:$0xff] }
  0x62   :  { %2192 = vmatprep.subr.bf16.mxu0 %v2191_v22  ;;  %2018 = vmatpush1.bf16.msra.mxu1 %v2017_v54  ;;  %v2215_v14 = vpack.c.bf16 %v627_v11, %v623_v9  ;;  %v626_v17 = vld [vmem:[%s4399_s3 + $0x3b0] sm:$0xff]  ;;  %v631_v21 = vld [vmem:[%s4399_s3 + $0x3d8] sm:$0xff]  ;;  %v2027_v22 = vpack.c.bf16 %v633_v20, %v629_v19  ;;  %v628_v24 = vld [vmem:[%s4399_s3 + $0x3c0] sm:$0xff] }
  0x63   :  { %2020 = vmatprep.subr.bf16.mxu1 %v2019_v61  ;;  %v2217_v18 = vpack.c.bf16 %v626_v17, %v622_v16  ;;  %v635_v23 = vld [vmem:[%s4399_s3 + $0x3f8] sm:$0xff]  ;;  %v632_v25 = vld [vmem:[%s4399_s3 + $0x3e0] sm:$0xff]  ;;  %v634_v29 = vld [vmem:[%s4399_s3 + $0x3f0] sm:$0xff] }
  0x64   :  { %v2219_v26 = vpack.c.bf16 %v635_v23, %v631_v21  ;;  %v637_v31 = vld [vmem:[%s4399_s3 + $0x408] sm:$0xff]  ;;  %v643_v35 = vld [vmem:[%s4399_s3 + $0x438] sm:$0xff]  ;;  %v135_v48 = vld [vmem:[%s4398_s2] sm:$0x3] }
  0x65   :  { %2194 = vmatpush1.bf16.msra.mxu0 %v2193_v27  ;;  %v2029_v27 = vpack.c.bf16 %v632_v25, %v628_v24  ;;  %v641_v32 = vld [vmem:[%s4399_s3 + $0x428] sm:$0xff]  ;;  %v341_v58 = vld [vmem:[#allocation2] sm:$0x80]  ;;  %v642_v8 = vld [vmem:[%s4399_s3 + $0x430] sm:$0xff] }
  0x66   :  { %2196 = vmatprep.subr.bf16.mxu0 %v2195_v28  ;;  %2022 = vmatpush1.bf16.msra.mxu1 %v2021_v2  ;;  %v630_v28 = vld [vmem:[%s4399_s3 + $0x3d0] sm:$0xff]  ;;  %v342_v56 = vld [vmem:[#allocation2 + $0x8] sm:$0x80]  ;;  %v636_v0 = vld [vmem:[%s4399_s3 + $0x400] sm:$0xff]  ;;  %v417_v6 = vrot.slane %v341_v58, 7 }
  0x67   :  { %2024 = vmatprep.subr.bf16.mxu1 %v2023_v10  ;;  %v2221_v30 = vpack.c.bf16 %v634_v29, %v630_v28  ;;  %v638_v2 = vld [vmem:[%s4399_s3 + $0x410] sm:$0xff]  ;;  %v645_v9 = vld [vmem:[%s4399_s3 + $0x448] sm:$0xff]  ;;  %v656_v58 = vld [vmem:[%s4399_s3 + $0x4a0] sm:$0xff] }
  0x68   :  { %v649_v10 = vld [vmem:[%s4399_s3 + $0x468] sm:$0xff]  ;;  %v2225_v24 = vpack.c.bf16 %v642_v8, %v638_v2  ;;  %v646_v28 = vld [vmem:[%s4399_s3 + $0x450] sm:$0xff]  ;;  %v667_v8 = vld [vmem:[%s4399_s3 + $0x4f8] sm:$0xff] }
  0x69   :  { %2198 = vmatpush1.bf16.msra.mxu0 %v2197_v33  ;;  %v639_v33 = vld [vmem:[%s4399_s3 + $0x418] sm:$0xff]  ;;  %v2035_v25 = vpack.c.bf16 %v649_v10, %v645_v9  ;;  %v693_v10 = vld [vmem:[%s4399_s3 + $0x5c8] sm:$0xff] }
  0x6a   :  { %2200 = vmatprep.subr.bf16.mxu0 %v2199_v34  ;;  %2026 = vmatpush1.bf16.msra.mxu1 %v2025_v15  ;;  %v2031_v34 = vpack.c.bf16 %v641_v32, %v637_v31  ;;  %v2223_v36 = vpack.c.bf16 %v643_v35, %v639_v33  ;;  %v651_v15 = vld [vmem:[%s4399_s3 + $0x478] sm:$0xff]  ;;  %v650_v33 = vld [vmem:[%s4399_s3 + $0x470] sm:$0xff]  ;;  %v657_v35 = vld [vmem:[%s4399_s3 + $0x4a8] sm:$0xff] }
  0x6b   :  { %2028 = vmatprep.subr.bf16.mxu1 %v2027_v22 }
  0x6d   :  { %2202 = vmatpush1.bf16.msra.mxu0 %v2201_v39 }
  0x6e   :  { %2204 = vmatprep.subr.bf16.mxu0 %v2203_v40  ;;  %2030 = vmatpush1.bf16.msra.mxu1 %v2029_v27  ;;  %v137_v40 = vlaneseq  ;;  %v648_v27 = vld [vmem:[%s4399_s3 + $0x460] sm:$0xff] }
  0x6f   :  { %2032 = vmatprep.subr.bf16.mxu1 %v2031_v34  ;;  %v653_v34 = vld [vmem:[%s4399_s3 + $0x488] sm:$0xff] }
  0x70   :  { %v3271_v43 = vshrl.u32 %v137_v40, 7  ;;  %v659_v40 = vld [vmem:[%s4399_s3 + $0x4b8] sm:$0xff] }
  0x71   :  { %2206 = vmatpush1.bf16.msra.mxu0 %v2205_v46 }
  0x72   :  { %2208 = vmatprep.subr.bf16.mxu0 %v2207_v53  ;;  %v139_v46 = vsub.s32 0, %v3271_v43  ;;  %v143_v7 = vsub.s32 1, %v3271_v43  ;;  %v3334_v20 = vadd.s32 16, %v3271_v43 }
  0x74   :  { %v3286_v49 = vrot.slane %v135_v48, %v139_v46  ;;  %v3290_v50 = vrot.slane %v135_v48, %v143_v7 }
  0x75   :  { %2210 = vmatpush1.bf16.msra.mxu0 %v2209_v57  ;;  %v370_v57 = vand.u32 15, %v3271_v43 }
  0x76   :  { %2212 = vmatprep.subr.bf16.mxu0 %v2211_v1  ;;  %v640_v1 = vld [vmem:[%s4399_s3 + $0x420] sm:$0xff] }
  0x77   :  { %vm3320_vm1 = vcmp.ne.s32.totalorder %v370_v57, 0  ;;  %v2033_v19 = vpack.c.bf16 %v640_v1, %v636_v0  ;;  %v652_v57 = vld [vmem:[%s4399_s3 + $0x480] sm:$0xff]  ;;  %v658_v0 = vld [vmem:[%s4399_s3 + $0x4b0] sm:$0xff]  ;;  %v661_v1 = vld [vmem:[%s4399_s3 + $0x4c8] sm:$0xff] }
  0x79   :  { %2214 = vmatpush1.bf16.msra.mxu0 %v2213_v5  ;;  %v420_v5 = vrot.slane %v342_v56, 7  ;;  %v2039_v56 = vpack.c.bf16 %v657_v35, %v653_v34  ;;  %v670_v34 = vld [vmem:[%s4399_s3 + $0x510] sm:$0xff] }
  0x7a   :  { %2216 = vmatprep.subr.bf16.mxu0 %v2215_v14  ;;  %v647_v14 = vld [vmem:[%s4399_s3 + $0x458] sm:$0xff]  ;;  %v674_v35 = vld [vmem:[%s4399_s3 + $0x530] sm:$0xff] }
  0x7b   :  { %v2227_v32 = vpack.c.bf16 %v651_v15, %v647_v14  ;;  %v664_v15 = vld [vmem:[%s4399_s3 + $0x4e0] sm:$0xff] }
  0x7d   :  { %2218 = vmatpush1.bf16.msra.mxu0 %v2217_v18 }
  0x7e   :  { %2220 = vmatprep.subr.bf16.mxu0 %v2219_v26  ;;  %v644_v26 = vld [vmem:[%s4399_s3 + $0x440] sm:$0xff] }
  0x81   :  { %2222 = vmatpush1.bf16.msra.mxu0 %v2221_v30 }
  0x82   :  { %2224 = vmatprep.subr.bf16.mxu0 %v2223_v36 }
  0xfe   :  { %v302_v37 = vpop.f32.mrb[0].mxu1 }
  0xff   :  { %v304_v38 = vpop.f32.mrb[1].mxu1 }
 0x102   :  { %v308_v39 = vpop.f32.mrb[2].mxu1 }
 0x103   :  { %v310_v41 = vpop.f32.mrb[3].mxu1 }
 0x106   :  { %v314_v42 = vpop.f32.mrb[4].mxu1 }
 0x107   :  { %v3273_v44 = vpop.f32.mrb[5].mxu1 }
 0x10a   :  { %v3275_v45 = vpop.f32.mrb[6].mxu1 }
 0x10b   :  { %v3278_v47 = vpop.f32.mrb[7].mxu1 }
 0x117   :  { %v213_v51 = vpop.f32.mrb[0].mxu0 }
 0x118   :  { %v214_v52 = vadd.f32 %v213_v51, %v3286_v49  ;;  %v215_v53 = vpop.f32.mrb[1].mxu0  ;;  %v2037_v51 = vpack.c.bf16 %v648_v27, %v644_v26  ;;  %v675_v26 = vld [vmem:[%s4399_s3 + $0x538] sm:$0xff] }
 0x119   :  { %v216_v54 = vadd.f32 %v215_v53, %v3290_v50 }
 0x11a   :  { %v303_v55 = vadd.f32 %v302_v37, %v214_v52  ;;  %v384_v52 = vand.u32 15, %v3334_v20  ;;  %v662_v20 = vld [vmem:[%s4399_s3 + $0x4d0] sm:$0xff] }
 0x11b   :  { %v305_v59 = vadd.f32 %v304_v38, %v216_v54  ;;  %v219_v60 = vpop.f32.mrb[2].mxu0 }
 0x11c   :  { %v3295_v61 = vmax.f32 %v303_v55, 0.0  ;;  %v220_v62 = vadd.f32 %v219_v60, %v3286_v49  ;;  %v221_v63 = vpop.f32.mrb[3].mxu0  ;;  %vm3419_vm2 = vcmp.ne.s32.totalorder %v384_v52, 0 }
 0x11d   :  { %v3307_v3 = vmax.f32 %v305_v59, 0.0  ;;  %v222_v4 = vadd.f32 %v221_v63, %v3290_v50  ;;  %v654_v63 = vld [vmem:[%s4399_s3 + $0x490] sm:$0xff] }
 0x11e   :  { %333 = vst [vmem:[#allocation2 + $0x10] sm:$0xff] %v3295_v61  ;;  %v309_v11 = vadd.f32 %v308_v39, %v220_v62  ;;  %v418_v13 = vrot.slane %v3295_v61, 7  ;;  %v655_v39 = vld [vmem:[%s4399_s3 + $0x498] sm:$0xff]  ;;  %v2233_v14 = vpack.c.bf16 %v658_v0, %v654_v63 }
 0x11f   :  { %334 = vst [vmem:[#allocation2 + $0x18] sm:$0xff] %v3307_v3  ;;  %v311_v16 = vadd.f32 %v310_v41, %v222_v4  ;;  %v225_v17 = vpop.f32.mrb[4].mxu0  ;;  %v421_v18 = vrot.slane %v3307_v3, 7  ;;  %v691_v63 = vld [vmem:[%s4399_s3 + $0x5b8] sm:$0xff] }
 0x120   :  { %v3336_v21 = vmax.f32 %v309_v11, 0.0  ;;  %v226_v22 = vadd.f32 %v225_v17, %v3286_v49  ;;  %v227_v23 = vpop.f32.mrb[5].mxu0  ;;  %v419_v37 = vsel %vm416_vm0, %v417_v6, %v418_v13  ;;  %v663_v6 = vld [vmem:[%s4399_s3 + $0x4d8] sm:$0xff] }
 0x121   :  { %v3348_v29 = vmax.f32 %v311_v16, 0.0  ;;  %v228_v30 = vadd.f32 %v227_v23, %v3290_v50  ;;  %v422_v31 = vsel %vm416_vm0, %v420_v5, %v421_v18  ;;  %v665_v5 = vld [vmem:[%s4399_s3 + $0x4e8] sm:$0xff] }
 0x122   :  { %335 = vst [vmem:[#allocation2 + $0x20] sm:$0xff] %v3336_v21  ;;  %v315_v36 = vadd.f32 %v314_v42, %v226_v22  ;;  %1765 = vmatprep.mubr.msk.f32.mxu1 %vm3320_vm1, %v422_v31  ;;  %1781 = vmatprep.mubr.msk.f32.mxu0 %vm3320_vm1, %v422_v31  ;;  %v423_v38 = vrot.slane %v3336_v21, 7  ;;  %v666_v22 = vld [vmem:[%s4399_s3 + $0x4f0] sm:$0xff]  ;;  %v669_v23 = vld [vmem:[%s4399_s3 + $0x508] sm:$0xff]  ;;  %v672_v31 = vld [vmem:[%s4399_s3 + $0x520] sm:$0xff] }
 0x123   :  { %v317_v41 = vadd.f32 %v3273_v44, %v228_v30  ;;  %v231_v42 = vpop.f32.mrb[6].mxu0  ;;  %1767 = vmatmul.mubr.msk.f32.vlgmr.msra.gmra.mrb[8].mxu1 %vm3320_vm1, %v419_v37  ;;  %1783 = vmatmul.mubr.msk.f32.vlgmr.msra.gmra.mrb[8].mxu0 %vm3320_vm1, %v419_v37  ;;  %v425_v48 = vrot.slane %v3348_v29, 7  ;;  %v2229_v44 = vpack.c.bf16 %v650_v33, %v646_v28  ;;  %v2237_v28 = vpack.c.bf16 %v666_v22, %v662_v20  ;;  %v668_v30 = vld [vmem:[%s4399_s3 + $0x500] sm:$0xff]  ;;  %v681_v37 = vld [vmem:[%s4399_s3 + $0x568] sm:$0xff]  ;;  %v698_v22 = vld [vmem:[%s4399_s3 + $0x5f0] sm:$0xff] }
 0x124   :  { %v3381_v53 = vmax.f32 %v315_v36, 0.0  ;;  %v232_v54 = vadd.f32 %v231_v42, %v3286_v49  ;;  %v233_v55 = vpop.f32.mrb[7].mxu0  ;;  %2034 = vmatpush1.bf16.msra.mxu1 %v2033_v19  ;;  %2226 = vmatpush1.bf16.msra.mxu0 %v2225_v24  ;;  %v2231_v49 = vpack.c.bf16 %v659_v40, %v655_v39  ;;  %v424_v2 = vsel %vm416_vm0, %v418_v13, %v423_v38  ;;  %v673_v24 = vld [vmem:[%s4399_s3 + $0x528] sm:$0xff]  ;;  %v683_v39 = vld [vmem:[%s4399_s3 + $0x578] sm:$0xff]  ;;  %v676_v42 = vld [vmem:[%s4399_s3 + $0x540] sm:$0xff] }
 0x125   :  { %v3390_v59 = vmax.f32 %v317_v41, 0.0  ;;  %v234_v60 = vadd.f32 %v233_v55, %v3290_v50  ;;  %v426_v62 = vsel %vm416_vm0, %v421_v18, %v425_v48  ;;  %2036 = vmatprep.subr.bf16.mxu1 %v2035_v25  ;;  %2228 = vmatprep.subr.bf16.mxu0 %v2227_v32  ;;  %v2041_v13 = vpack.c.bf16 %v656_v58, %v652_v57  ;;  %v671_v25 = vld [vmem:[%s4399_s3 + $0x518] sm:$0xff]  ;;  %v677_v36 = vld [vmem:[%s4399_s3 + $0x548] sm:$0xff]  ;;  %v678_v55 = vld [vmem:[%s4399_s3 + $0x550] sm:$0xff] }
 0x126   :  { %337 = vst [vmem:[#allocation2 + $0x30] sm:$0xff] %v3381_v53  ;;  %v321_v50 = vadd.f32 %v3275_v45, %v232_v54  ;;  %984 = vmatprep.mubr.f32.mxu1 %v426_v62  ;;  %1251 = vmatprep.mubr.f32.mxu0 %v426_v62  ;;  %v427_v4 = vrot.slane %v3381_v53, 7  ;;  %v2043_v18 = vpack.c.bf16 %v665_v5, %v661_v1  ;;  %v680_v54 = vld [vmem:[%s4399_s3 + $0x560] sm:$0xff]  ;;  %v682_v57 = vld [vmem:[%s4399_s3 + $0x570] sm:$0xff]  ;;  %v685_v58 = vld [vmem:[%s4399_s3 + $0x588] sm:$0xff] }
 0x127   :  { %338 = vst [vmem:[#allocation2 + $0x38] sm:$0xff] %v3390_v59  ;;  %v323_v45 = vadd.f32 %v3278_v47, %v234_v60  ;;  %985 = vmatmul.mubr.f32.gmra.mrb[10].mxu1 %v424_v2  ;;  %1252 = vmatmul.mubr.f32.gmra.mrb[10].mxu0 %v424_v2  ;;  %v429_v9 = vrot.slane %v3390_v59, 7  ;;  %v660_v47 = vld [vmem:[%s4399_s3 + $0x4c0] sm:$0xff]  ;;  %v2235_v19 = vpack.c.bf16 %v667_v8, %v663_v6  ;;  %v689_v62 = vld [vmem:[%s4399_s3 + $0x5a8] sm:$0xff] }
 0x128   :  { %v3423_v11 = vmax.f32 %v321_v50, 0.0  ;;  %2038 = vmatpush1.bf16.msra.mxu1 %v2037_v51  ;;  %2230 = vmatpush1.bf16.msra.mxu0 %v2229_v44  ;;  %v428_v12 = vsel %vm416_vm0, %v423_v38, %v427_v4  ;;  %v2045_v27 = vpack.c.bf16 %v664_v15, %v660_v47  ;;  %v2047_v32 = vpack.c.bf16 %v673_v24, %v669_v23  ;;  %v679_v38 = vld [vmem:[%s4399_s3 + $0x558] sm:$0xff]  ;;  %v684_v5 = vld [vmem:[%s4399_s3 + $0x580] sm:$0xff]  ;;  %v701_v23 = vld [vmem:[%s4399_s3 + $0x608] sm:$0xff] }
 0x129   :  { %v3434_v16 = vmax.f32 %v323_v45, 0.0  ;;  %v430_v17 = vsel %vm416_vm0, %v425_v48, %v429_v9  ;;  %2040 = vmatprep.subr.bf16.mxu1 %v2039_v56  ;;  %2232 = vmatprep.subr.bf16.mxu0 %v2231_v49  ;;  %v2239_v33 = vpack.c.bf16 %v675_v26, %v671_v25  ;;  %v2049_v40 = vpack.c.bf16 %v672_v31, %v668_v30  ;;  %v687_v49 = vld [vmem:[%s4399_s3 + $0x598] sm:$0xff]  ;;  %v688_v6 = vld [vmem:[%s4399_s3 + $0x5a0] sm:$0xff]  ;;  %v686_v45 = vld [vmem:[%s4399_s3 + $0x590] sm:$0xff] }
 0x12a   :  { %339 = vst [vmem:[#allocation2 + $0x40] sm:$0xff] %v3423_v11  ;;  %1769 = vmatprep.mubr.msk.f32.mxu1 %vm3419_vm2, %v430_v17  ;;  %1785 = vmatprep.mubr.msk.f32.mxu0 %vm3419_vm2, %v430_v17  ;;  %v2241_v41 = vpack.c.bf16 %v674_v35, %v670_v34  ;;  %v2051_v51 = vpack.c.bf16 %v681_v37, %v677_v36  ;;  %v692_v17 = vld [vmem:[%s4399_s3 + $0x5c0] sm:$0xff]  ;;  %v705_v24 = vld [vmem:[%s4399_s3 + $0x628] sm:$0xff]  ;;  %v703_v25 = vld [vmem:[%s4399_s3 + $0x618] sm:$0xff] }
 0x12b   :  { %340 = vst [vmem:[#allocation2 + $0x48] sm:$0xff] %v3434_v16  ;;  %1771 = vmatmul.mubr.msk.f32.gmra.mrb[12].mxu1 %vm3419_vm2, %v428_v12  ;;  %1787 = vmatmul.mubr.msk.f32.gmra.mrb[12].mxu0 %vm3419_vm2, %v428_v12  ;;  %v2243_v52 = vpack.c.bf16 %v683_v39, %v679_v38  ;;  %v2053_v50 = vpack.c.bf16 %v680_v54, %v676_v42  ;;  %v697_v12 = vld [vmem:[%s4399_s3 + $0x5e8] sm:$0xff]  ;;  %v707_v26 = vld [vmem:[%s4399_s3 + $0x638] sm:$0xff]  ;;  %v700_v30 = vld [vmem:[%s4399_s3 + $0x600] sm:$0xff] }
 0x12c   :  { %2042 = vmatpush1.bf16.msra.mxu1 %v2041_v13  ;;  %2234 = vmatpush1.bf16.msra.mxu0 %v2233_v14  ;;  %v2245_v2 = vpack.c.bf16 %v682_v57, %v678_v55  ;;  %v2247_v8 = vpack.c.bf16 %v691_v63, %v687_v49  ;;  %v695_v13 = vld [vmem:[%s4399_s3 + $0x5d8] sm:$0xff]  ;;  %v2057_v47 = vpack.c.bf16 %v688_v6, %v684_v5  ;;  %v704_v31 = vld [vmem:[%s4399_s3 + $0x620] sm:$0xff]  ;;  %v702_v34 = vld [vmem:[%s4399_s3 + $0x610] sm:$0xff] }
 0x12d   :  { %2044 = vmatprep.subr.bf16.mxu1 %v2043_v18  ;;  %2236 = vmatprep.subr.bf16.mxu0 %v2235_v19  ;;  %v699_v14 = vld [vmem:[%s4399_s3 + $0x5f8] sm:$0xff]  ;;  %v696_v18 = vld [vmem:[%s4399_s3 + $0x5e0] sm:$0xff]  ;;  %v2059_v19 = vpack.c.bf16 %v697_v12, %v693_v10  ;;  %v706_v35 = vld [vmem:[%s4399_s3 + $0x630] sm:$0xff] }
 0x12e   :  { %v2251_v20 = vpack.c.bf16 %v699_v14, %v695_v13  ;;  %v709_v36 = vld [vmem:[%s4399_s3 + $0x648] sm:$0xff]  ;;  %v711_v38 = vld [vmem:[%s4399_s3 + $0x658] sm:$0xff]  ;;  %v708_v42 = vld [vmem:[%s4399_s3 + $0x640] sm:$0xff] }
 0x12f   :  { %v713_v37 = vld [vmem:[%s4399_s3 + $0x668] sm:$0xff]  ;;  %v715_v39 = vld [vmem:[%s4399_s3 + $0x678] sm:$0xff]  ;;  %v710_v54 = vld [vmem:[%s4399_s3 + $0x650] sm:$0xff] }
 0x130   :  { %2046 = vmatpush1.bf16.msra.mxu1 %v2045_v27  ;;  %2238 = vmatpush1.bf16.msra.mxu0 %v2237_v28  ;;  %v2061_v27 = vpack.c.bf16 %v696_v18, %v692_v17  ;;  %v714_v55 = vld [vmem:[%s4399_s3 + $0x670] sm:$0xff]  ;;  %v719_v57 = vld [vmem:[%s4399_s3 + $0x698] sm:$0xff]  ;;  %v716_v49 = vld [vmem:[%s4399_s3 + $0x680] sm:$0xff] }
 0x131   :  { %v349_v48 = vld [vmem:[#allocation2 + $0x40] sm:$0x7f]  ;;  %2048 = vmatprep.subr.bf16.mxu1 %v2047_v32  ;;  %2240 = vmatprep.subr.bf16.mxu0 %v2239_v33  ;;  %v2063_v32 = vpack.c.bf16 %v705_v24, %v701_v23  ;;  %v2255_v33 = vpack.c.bf16 %v707_v26, %v703_v25  ;;  %v725_v5 = vld [vmem:[%s4399_s3 + $0x6c8] sm:$0xff] }
 0x132   :  { %v350_v44 = vld [vmem:[#allocation2 + $0x48] sm:$0x7f]  ;;  %v431_v56 = vrot.slane %v349_v48, 7  ;;  %v712_v48 = vld [vmem:[%s4399_s3 + $0x660] sm:$0xff] }
 0x133   :  { %v433_v60 = vrot.slane %v350_v44, 7  ;;  %v717_v44 = vld [vmem:[%s4399_s3 + $0x688] sm:$0xff]  ;;  %v720_v63 = vld [vmem:[%s4399_s3 + $0x6a0] sm:$0xff] }
 0x134   :  { %v432_v0 = vsel %vm416_vm0, %v427_v4, %v431_v56  ;;  %2050 = vmatpush1.bf16.msra.mxu1 %v2049_v40  ;;  %2242 = vmatpush1.bf16.msra.mxu0 %v2241_v41  ;;  %v2055_v4 = vpack.c.bf16 %v689_v62, %v685_v58  ;;  %v2065_v40 = vpack.c.bf16 %v704_v31, %v700_v30  ;;  %v721_v56 = vld [vmem:[%s4399_s3 + $0x6a8] sm:$0xff]  ;;  %v723_v58 = vld [vmem:[%s4399_s3 + $0x6b8] sm:$0xff]  ;;  %v724_v10 = vld [vmem:[%s4399_s3 + $0x6c0] sm:$0xff] }
 0x135   :  { %v434_v1 = vsel %vm416_vm0, %v429_v9, %v433_v60  ;;  %2052 = vmatprep.subr.bf16.mxu1 %v2051_v51  ;;  %2244 = vmatprep.subr.bf16.mxu0 %v2243_v52  ;;  %v690_v9 = vld [vmem:[%s4399_s3 + $0x5b0] sm:$0xff]  ;;  %v2257_v41 = vpack.c.bf16 %v706_v35, %v702_v34  ;;  %v2067_v51 = vpack.c.bf16 %v713_v37, %v709_v36  ;;  %v729_v6 = vld [vmem:[%s4399_s3 + $0x6e8] sm:$0xff]  ;;  %v728_v12 = vld [vmem:[%s4399_s3 + $0x6e0] sm:$0xff] }
 0x136   :  { %996 = vmatprep.mubr.f32.mxu1 %v434_v1  ;;  %1263 = vmatprep.mubr.f32.mxu0 %v434_v1  ;;  %v2249_v15 = vpack.c.bf16 %v690_v9, %v686_v45  ;;  %v2259_v52 = vpack.c.bf16 %v715_v39, %v711_v38  ;;  %v2069_v60 = vpack.c.bf16 %v712_v48, %v708_v42  ;;  %v733_v17 = vld [vmem:[%s4399_s3 + $0x708] sm:$0xff]  ;;  %v732_v23 = vld [vmem:[%s4399_s3 + $0x700] sm:$0xff] }
 0x137   :  { %997 = vmatmul.mubr.f32.gmra.mrb[14].mxu1 %v432_v0  ;;  %1264 = vmatmul.mubr.f32.gmra.mrb[14].mxu0 %v432_v0  ;;  %v2261_v62 = vpack.c.bf16 %v714_v55, %v710_v54  ;;  %v2071_v0 = vpack.c.bf16 %v721_v56, %v717_v44  ;;  %v2263_v1 = vpack.c.bf16 %v723_v58, %v719_v57  ;;  %v737_v18 = vld [vmem:[%s4399_s3 + $0x728] sm:$0xff]  ;;  %v736_v24 = vld [vmem:[%s4399_s3 + $0x720] sm:$0xff] }
 0x138   :  { %1067 = vmatprep.mubr.f32.mxu1 %v3307_v3  ;;  %1334 = vmatprep.mubr.f32.mxu0 %v3307_v3  ;;  %v694_v3 = vld [vmem:[%s4399_s3 + $0x5d0] sm:$0xff]  ;;  %v2073_v45 = vpack.c.bf16 %v720_v63, %v716_v49  ;;  %v2075_v13 = vpack.c.bf16 %v729_v6, %v725_v5  ;;  %v2079_v25 = vpack.c.bf16 %v737_v18, %v733_v17  ;;  %v741_v30 = vld [vmem:[%s4399_s3 + $0x748] sm:$0xff]  ;;  %v740_v36 = vld [vmem:[%s4399_s3 + $0x740] sm:$0xff] }
 0x139   :  { %2054 = vmatpush1.bf16.msra.mxu1 %v2053_v50  ;;  %2246 = vmatpush1.bf16.msra.mxu0 %v2245_v2  ;;  %v2253_v28 = vpack.c.bf16 %v698_v22, %v694_v3  ;;  %v718_v50 = vld [vmem:[%s4399_s3 + $0x690] sm:$0xff]  ;;  %v2077_v3 = vpack.c.bf16 %v728_v12, %v724_v10  ;;  %v745_v31 = vld [vmem:[%s4399_s3 + $0x768] sm:$0xff]  ;;  %v2081_v34 = vpack.c.bf16 %v736_v24, %v732_v23  ;;  %v744_v37 = vld [vmem:[%s4399_s3 + $0x760] sm:$0xff] }
 0x13a   :  { %2056 = vmatprep.subr.bf16.mxu1 %v2055_v4  ;;  %2248 = vmatprep.subr.bf16.mxu0 %v2247_v8  ;;  %v722_v2 = vld [vmem:[%s4399_s3 + $0x6b0] sm:$0xff]  ;;  %v727_v4 = vld [vmem:[%s4399_s3 + $0x6d8] sm:$0xff]  ;;  %v2083_v38 = vpack.c.bf16 %v745_v31, %v741_v30  ;;  %v749_v42 = vld [vmem:[%s4399_s3 + $0x788] sm:$0xff]  ;;  %v2085_v54 = vpack.c.bf16 %v744_v37, %v740_v36 }
 0x13b   :  { %v731_v8 = vld [vmem:[%s4399_s3 + $0x6f8] sm:$0xff]  ;;  %v2265_v9 = vpack.c.bf16 %v722_v2, %v718_v50  ;;  %v753_v48 = vld [vmem:[%s4399_s3 + $0x7a8] sm:$0xff]  ;;  %v748_v44 = vld [vmem:[%s4399_s3 + $0x780] sm:$0xff] }
 0x13c   :  { %v2267_v14 = vpack.c.bf16 %v731_v8, %v727_v4  ;;  %v752_v56 = vld [vmem:[%s4399_s3 + $0x7a0] sm:$0xff]  ;;  %v2087_v57 = vpack.c.bf16 %v753_v48, %v749_v42  ;;  %v757_v49 = vld [vmem:[%s4399_s3 + $0x7c8] sm:$0xff] }
 0x13d   :  { %2058 = vmatpush1.bf16.msra.mxu1 %v2057_v47  ;;  %2250 = vmatpush1.bf16.msra.mxu0 %v2249_v15  ;;  %v726_v47 = vld [vmem:[%s4399_s3 + $0x6d0] sm:$0xff]  ;;  %v761_v63 = vld [vmem:[%s4399_s3 + $0x7e8] sm:$0xff]  ;;  %v2089_v50 = vpack.c.bf16 %v752_v56, %v748_v44  ;;  %v756_v5 = vld [vmem:[%s4399_s3 + $0x7c0] sm:$0xff] }
 0x13e   :  { %2060 = vmatprep.subr.bf16.mxu1 %v2059_v19  ;;  %2252 = vmatprep.subr.bf16.mxu0 %v2251_v20  ;;  %v730_v15 = vld [vmem:[%s4399_s3 + $0x6f0] sm:$0xff]  ;;  %v735_v19 = vld [vmem:[%s4399_s3 + $0x718] sm:$0xff]  ;;  %v760_v6 = vld [vmem:[%s4399_s3 + $0x7e0] sm:$0xff]  ;;  %v2091_v4 = vpack.c.bf16 %v761_v63, %v757_v49 }
 0x13f   :  { %v739_v20 = vld [vmem:[%s4399_s3 + $0x738] sm:$0xff]  ;;  %v2269_v22 = vpack.c.bf16 %v730_v15, %v726_v47  ;;  %v765_v10 = vld [vmem:[%s4399_s3 + $0x808] sm:$0xff]  ;;  %v2093_v47 = vpack.c.bf16 %v760_v6, %v756_v5  ;;  %v772_v30 = vld [vmem:[%s4399_s3 + $0x840] sm:$0xff]  ;;  %v478_v5 = vrot.slane %v3348_v29, 1 }
 0x140   :  { %v2271_v26 = vpack.c.bf16 %v739_v20, %v735_v19  ;;  %v769_v12 = vld [vmem:[%s4399_s3 + $0x828] sm:$0xff]  ;;  %v764_v19 = vld [vmem:[%s4399_s3 + $0x800] sm:$0xff]  ;;  %v791_v56 = vld [vmem:[%s4399_s3 + $0x8d8] sm:$0xff] }
 0x141   :  { %2062 = vmatpush1.bf16.msra.mxu1 %v2061_v27  ;;  %2254 = vmatpush1.bf16.msra.mxu0 %v2253_v28  ;;  %v734_v27 = vld [vmem:[%s4399_s3 + $0x710] sm:$0xff]  ;;  %v2095_v17 = vpack.c.bf16 %v769_v12, %v765_v10  ;;  %v768_v20 = vld [vmem:[%s4399_s3 + $0x820] sm:$0xff]  ;;  %v773_v23 = vld [vmem:[%s4399_s3 + $0x848] sm:$0xff] }
 0x142   :  { %2064 = vmatprep.subr.bf16.mxu1 %v2063_v32  ;;  %2256 = vmatprep.subr.bf16.mxu0 %v2255_v33  ;;  %v738_v28 = vld [vmem:[%s4399_s3 + $0x730] sm:$0xff]  ;;  %v743_v32 = vld [vmem:[%s4399_s3 + $0x758] sm:$0xff]  ;;  %v777_v24 = vld [vmem:[%s4399_s3 + $0x868] sm:$0xff] }
 0x143   :  { %v747_v33 = vld [vmem:[%s4399_s3 + $0x778] sm:$0xff]  ;;  %v2273_v35 = vpack.c.bf16 %v738_v28, %v734_v27  ;;  %v2097_v27 = vpack.c.bf16 %v768_v20, %v764_v19  ;;  %v776_v31 = vld [vmem:[%s4399_s3 + $0x860] sm:$0xff]  ;;  %v781_v36 = vld [vmem:[%s4399_s3 + $0x888] sm:$0xff] }
 0x144   :  { %v2275_v39 = vpack.c.bf16 %v747_v33, %v743_v32  ;;  %v2099_v32 = vpack.c.bf16 %v777_v24, %v773_v23  ;;  %v785_v37 = vld [vmem:[%s4399_s3 + $0x8a8] sm:$0xff]  ;;  %v784_v42 = vld [vmem:[%s4399_s3 + $0x8a0] sm:$0xff]  ;;  %v798_v12 = vld [vmem:[%s4399_s3 + $0x910] sm:$0xff] }
 0x145   :  { %2066 = vmatpush1.bf16.msra.mxu1 %v2065_v40  ;;  %2258 = vmatpush1.bf16.msra.mxu0 %v2257_v41  ;;  %v742_v40 = vld [vmem:[%s4399_s3 + $0x750] sm:$0xff]  ;;  %v2103_v48 = vpack.c.bf16 %v785_v37, %v781_v36  ;;  %v793_v44 = vld [vmem:[%s4399_s3 + $0x8e8] sm:$0xff]  ;;  %v792_v49 = vld [vmem:[%s4399_s3 + $0x8e0] sm:$0xff] }
 0x146   :  { %2068 = vmatprep.subr.bf16.mxu1 %v2067_v51  ;;  %2260 = vmatprep.subr.bf16.mxu0 %v2259_v52  ;;  %v746_v41 = vld [vmem:[%s4399_s3 + $0x770] sm:$0xff]  ;;  %v751_v51 = vld [vmem:[%s4399_s3 + $0x798] sm:$0xff]  ;;  %v801_v6 = vld [vmem:[%s4399_s3 + $0x928] sm:$0xff] }
 0x147   :  { %v755_v52 = vld [vmem:[%s4399_s3 + $0x7b8] sm:$0xff]  ;;  %v2277_v55 = vpack.c.bf16 %v746_v41, %v742_v40  ;;  %v2101_v40 = vpack.c.bf16 %v776_v31, %v772_v30  ;;  %v780_v41 = vld [vmem:[%s4399_s3 + $0x880] sm:$0xff]  ;;  %v806_v24 = vld [vmem:[%s4399_s3 + $0x950] sm:$0xff] }
 0x148   :  { %v2279_v58 = vpack.c.bf16 %v755_v52, %v751_v51  ;;  %v782_v52 = vld [vmem:[%s4399_s3 + $0x890] sm:$0xff]  ;;  %v800_v10 = vld [vmem:[%s4399_s3 + $0x920] sm:$0xff]  ;;  %v811_v19 = vld [vmem:[%s4399_s3 + $0x978] sm:$0xff] }
 0x149   :  { %2070 = vmatpush1.bf16.msra.mxu1 %v2069_v60  ;;  %2262 = vmatpush1.bf16.msra.mxu0 %v2261_v62  ;;  %v750_v60 = vld [vmem:[%s4399_s3 + $0x790] sm:$0xff]  ;;  %v808_v23 = vld [vmem:[%s4399_s3 + $0x960] sm:$0xff]  ;;  %v815_v30 = vld [vmem:[%s4399_s3 + $0x998] sm:$0xff] }
 0x14a   :  { %2072 = vmatprep.subr.bf16.mxu1 %v2071_v0  ;;  %2264 = vmatprep.subr.bf16.mxu0 %v2263_v1  ;;  %v754_v62 = vld [vmem:[%s4399_s3 + $0x7b0] sm:$0xff]  ;;  %v759_v0 = vld [vmem:[%s4399_s3 + $0x7d8] sm:$0xff]  ;;  %v816_v36 = vld [vmem:[%s4399_s3 + $0x9a0] sm:$0xff] }
 0x14b   :  { %v763_v1 = vld [vmem:[%s4399_s3 + $0x7f8] sm:$0xff]  ;;  %v2281_v2 = vpack.c.bf16 %v754_v62, %v750_v60  ;;  %v788_v62 = vld [vmem:[%s4399_s3 + $0x8c0] sm:$0xff]  ;;  %v814_v37 = vld [vmem:[%s4399_s3 + $0x990] sm:$0xff] }
 0x14c   :  { %v2283_v8 = vpack.c.bf16 %v763_v1, %v759_v0  ;;  %v352_v60 = vld [vmem:[#allocation2 + $0x18] sm:$0xfe]  ;;  %v790_v1 = vld [vmem:[%s4399_s3 + $0x8d0] sm:$0xff] }
 0x14d   :  { %2074 = vmatpush1.bf16.msra.mxu1 %v2073_v45  ;;  %2266 = vmatpush1.bf16.msra.mxu0 %v2265_v9  ;;  %v758_v45 = vld [vmem:[%s4399_s3 + $0x7d0] sm:$0xff]  ;;  %v819_v31 = vld [vmem:[%s4399_s3 + $0x9b8] sm:$0xff] }
 0x14e   :  { %2076 = vmatprep.subr.bf16.mxu1 %v2075_v13  ;;  %2268 = vmatprep.subr.bf16.mxu0 %v2267_v14  ;;  %v762_v9 = vld [vmem:[%s4399_s3 + $0x7f0] sm:$0xff]  ;;  %v767_v13 = vld [vmem:[%s4399_s3 + $0x818] sm:$0xff] }
 0x14f   :  { %v771_v14 = vld [vmem:[%s4399_s3 + $0x838] sm:$0xff]  ;;  %v2285_v15 = vpack.c.bf16 %v762_v9, %v758_v45  ;;  %v2109_v45 = vpack.c.bf16 %v792_v49, %v788_v62  ;;  %v796_v9 = vld [vmem:[%s4399_s3 + $0x900] sm:$0xff] }
 0x150   :  { %v2287_v18 = vpack.c.bf16 %v771_v14, %v767_v13  ;;  %v2113_v20 = vpack.c.bf16 %v800_v10, %v796_v9  ;;  %v835_v62 = vld [vmem:[%s4399_s3 + $0xa38] sm:$0xff] }
 0x151   :  { %2078 = vmatpush1.bf16.msra.mxu1 %v2077_v3  ;;  %2270 = vmatpush1.bf16.msra.mxu0 %v2269_v22  ;;  %v766_v3 = vld [vmem:[%s4399_s3 + $0x810] sm:$0xff] }
 0x152   :  { %2080 = vmatprep.subr.bf16.mxu1 %v2079_v25  ;;  %2272 = vmatprep.subr.bf16.mxu0 %v2271_v26  ;;  %v770_v22 = vld [vmem:[%s4399_s3 + $0x830] sm:$0xff]  ;;  %v775_v25 = vld [vmem:[%s4399_s3 + $0x858] sm:$0xff] }
 0x153   :  { %v779_v26 = vld [vmem:[%s4399_s3 + $0x878] sm:$0xff]  ;;  %v2289_v28 = vpack.c.bf16 %v770_v22, %v766_v3 }
 0x154   :  { %v2291_v33 = vpack.c.bf16 %v779_v26, %v775_v25  ;;  %v810_v26 = vld [vmem:[%s4399_s3 + $0x970] sm:$0xff] }
 0x155   :  { %2082 = vmatpush1.bf16.msra.mxu1 %v2081_v34  ;;  %2274 = vmatpush1.bf16.msra.mxu0 %v2273_v35  ;;  %v774_v34 = vld [vmem:[%s4399_s3 + $0x850] sm:$0xff] }
 0x156   :  { %2084 = vmatprep.subr.bf16.mxu1 %v2083_v38  ;;  %2276 = vmatprep.subr.bf16.mxu0 %v2275_v39  ;;  %v778_v35 = vld [vmem:[%s4399_s3 + $0x870] sm:$0xff]  ;;  %v783_v38 = vld [vmem:[%s4399_s3 + $0x898] sm:$0xff] }
 0x157   :  { %v787_v39 = vld [vmem:[%s4399_s3 + $0x8b8] sm:$0xff] }
 0x158   :  { %v2295_v51 = vpack.c.bf16 %v787_v39, %v783_v38  ;;  %v2311_v38 = vpack.c.bf16 %v819_v31, %v815_v30  ;;  %v818_v39 = vld [vmem:[%s4399_s3 + $0x9b0] sm:$0xff]  ;;  %v857_v30 = vld [vmem:[%s4399_s3 + $0xae8] sm:$0xff]  ;;  %v855_v31 = vld [vmem:[%s4399_s3 + $0xad8] sm:$0xff] }
 0x159   :  { %2086 = vmatpush1.bf16.msra.mxu1 %v2085_v54  ;;  %2278 = vmatpush1.bf16.msra.mxu0 %v2277_v55  ;;  %v786_v54 = vld [vmem:[%s4399_s3 + $0x8b0] sm:$0xff]  ;;  %v789_v55 = vld [vmem:[%s4399_s3 + $0x8c8] sm:$0xff] }
 0x15a   :  { %2088 = vmatprep.subr.bf16.mxu1 %v2087_v57  ;;  %2280 = vmatprep.subr.bf16.mxu0 %v2279_v58  ;;  %v795_v57 = vld [vmem:[%s4399_s3 + $0x8f8] sm:$0xff]  ;;  %v2105_v58 = vpack.c.bf16 %v784_v42, %v780_v41  ;;  %v2107_v63 = vpack.c.bf16 %v793_v44, %v789_v55  ;;  %v824_v55 = vld [vmem:[%s4399_s3 + $0x9e0] sm:$0xff]  ;;  %v822_v44 = vld [vmem:[%s4399_s3 + $0x9d0] sm:$0xff] }
 0x15b   :  { %v2299_v0 = vpack.c.bf16 %v795_v57, %v791_v56  ;;  %v823_v41 = vld [vmem:[%s4399_s3 + $0x9d8] sm:$0xff]  ;;  %v826_v57 = vld [vmem:[%s4399_s3 + $0x9f0] sm:$0xff] }
 0x15c   :  { %v827_v42 = vld [vmem:[%s4399_s3 + $0x9f8] sm:$0xff] }
 0x15d   :  { %2090 = vmatpush1.bf16.msra.mxu1 %v2089_v50  ;;  %2282 = vmatpush1.bf16.msra.mxu0 %v2281_v2  ;;  %v797_v50 = vld [vmem:[%s4399_s3 + $0x908] sm:$0xff]  ;;  %v477_v2 = vrot.slane %v352_v60, 1  ;;  %v2315_v56 = vpack.c.bf16 %v827_v42, %v823_v41  ;;  %v863_v42 = vld [vmem:[%s4399_s3 + $0xb18] sm:$0xff] }
 0x15e   :  { %2092 = vmatprep.subr.bf16.mxu1 %v2091_v4  ;;  %2284 = vmatprep.subr.bf16.mxu0 %v2283_v8  ;;  %v799_v4 = vld [vmem:[%s4399_s3 + $0x918] sm:$0xff]  ;;  %v2111_v13 = vpack.c.bf16 %v801_v6, %v797_v50  ;;  %v833_v60 = vld [vmem:[%s4399_s3 + $0xa28] sm:$0xff]  ;;  %v830_v50 = vld [vmem:[%s4399_s3 + $0xa10] sm:$0xff] }
 0x15f   :  { %v803_v8 = vld [vmem:[%s4399_s3 + $0x938] sm:$0xff]  ;;  %v834_v6 = vld [vmem:[%s4399_s3 + $0xa30] sm:$0xff]  ;;  %v865_v41 = vld [vmem:[%s4399_s3 + $0xb28] sm:$0xff] }
 0x160   :  { %v2303_v14 = vpack.c.bf16 %v803_v8, %v799_v4  ;;  %v837_v4 = vld [vmem:[%s4399_s3 + $0xa48] sm:$0xff]  ;;  %v2321_v10 = vpack.c.bf16 %v834_v6, %v830_v50  ;;  %v872_v50 = vld [vmem:[%s4399_s3 + $0xb60] sm:$0xff] }
 0x161   :  { %2094 = vmatpush1.bf16.msra.mxu1 %v2093_v47  ;;  %2286 = vmatpush1.bf16.msra.mxu0 %v2285_v15  ;;  %v805_v47 = vld [vmem:[%s4399_s3 + $0x948] sm:$0xff] }
 0x162   :  { %2096 = vmatprep.subr.bf16.mxu1 %v2095_v17  ;;  %2288 = vmatprep.subr.bf16.mxu0 %v2287_v18  ;;  %v809_v15 = vld [vmem:[%s4399_s3 + $0x968] sm:$0xff]  ;;  %v479_v17 = vsel %vm473_vm3, %v477_v2, %v478_v5  ;;  %v807_v18 = vld [vmem:[%s4399_s3 + $0x958] sm:$0xff] }
 0x163   :  { %v2115_v22 = vpack.c.bf16 %v809_v15, %v805_v47  ;;  %v2307_v25 = vpack.c.bf16 %v811_v19, %v807_v18  ;;  %v841_v8 = vld [vmem:[%s4399_s3 + $0xa68] sm:$0xff]  ;;  %v842_v15 = vld [vmem:[%s4399_s3 + $0xa70] sm:$0xff]  ;;  %v847_v19 = vld [vmem:[%s4399_s3 + $0xa98] sm:$0xff] }
 0x164   :  { %1068 = vmatmul.mubr.f32.vlgmr.msra.gmra.mrb[8].mxu1 %v3295_v61  ;;  %1335 = vmatmul.mubr.f32.vlgmr.msra.gmra.mrb[8].mxu0 %v3295_v61  ;;  %v2293_v61 = vpack.c.bf16 %v778_v35, %v774_v34  ;;  %v812_v35 = vld [vmem:[%s4399_s3 + $0x980] sm:$0xff]  ;;  %v849_v18 = vld [vmem:[%s4399_s3 + $0xaa8] sm:$0xff] }
 0x165   :  { %1073 = vmatprep.mubr.f32.mxu1 %v3348_v29  ;;  %2098 = vmatpush1.bf16.msra.mxu1 %v2097_v27  ;;  %v813_v27 = vld [vmem:[%s4399_s3 + $0x988] sm:$0xff] }
 0x166   :  { %1340 = vmatprep.mubr.f32.mxu0 %v3348_v29  ;;  %2290 = vmatpush1.bf16.msra.mxu0 %v2289_v28  ;;  %v817_v28 = vld [vmem:[%s4399_s3 + $0x9a8] sm:$0xff] }
 0x167   :  { %2100 = vmatprep.subr.bf16.mxu1 %v2099_v32  ;;  %2292 = vmatprep.subr.bf16.mxu0 %v2291_v33  ;;  %v2309_v33 = vpack.c.bf16 %v810_v26, %v806_v24  ;;  %v2119_v34 = vpack.c.bf16 %v817_v28, %v813_v27  ;;  %v848_v24 = vld [vmem:[%s4399_s3 + $0xaa0] sm:$0xff]  ;;  %v850_v27 = vld [vmem:[%s4399_s3 + $0xab0] sm:$0xff]  ;;  %v853_v28 = vld [vmem:[%s4399_s3 + $0xac8] sm:$0xff] }
 0x168   :  { %1074 = vmatmul.mubr.f32.gmra.mrb[10].mxu1 %v3336_v21  ;;  %1341 = vmatmul.mubr.f32.gmra.mrb[10].mxu0 %v3336_v21  ;;  %v2297_v21 = vpack.c.bf16 %v786_v54, %v782_v52  ;;  %v820_v54 = vld [vmem:[%s4399_s3 + $0x9c0] sm:$0xff] }
 0x169   :  { %1079 = vmatprep.mubr.f32.mxu1 %v3390_v59  ;;  %2102 = vmatpush1.bf16.msra.mxu1 %v2101_v40  ;;  %v821_v40 = vld [vmem:[%s4399_s3 + $0x9c8] sm:$0xff]  ;;  %v2125_v49 = vpack.c.bf16 %v824_v55, %v820_v54  ;;  %v860_v55 = vld [vmem:[%s4399_s3 + $0xb00] sm:$0xff] }
 0x16a   :  { %1346 = vmatprep.mubr.f32.mxu0 %v3390_v59  ;;  %2294 = vmatpush1.bf16.msra.mxu0 %v2293_v61  ;;  %v794_v59 = vld [vmem:[%s4399_s3 + $0x8f0] sm:$0xff]  ;;  %v825_v61 = vld [vmem:[%s4399_s3 + $0x9e8] sm:$0xff] }
 0x16b   :  { %2104 = vmatprep.subr.bf16.mxu1 %v2103_v48  ;;  %2296 = vmatprep.subr.bf16.mxu0 %v2295_v51  ;;  %v2121_v48 = vpack.c.bf16 %v816_v36, %v812_v35  ;;  %v2313_v51 = vpack.c.bf16 %v818_v39, %v814_v37  ;;  %v2123_v52 = vpack.c.bf16 %v825_v61, %v821_v40  ;;  %v852_v36 = vld [vmem:[%s4399_s3 + $0xac0] sm:$0xff]  ;;  %v858_v40 = vld [vmem:[%s4399_s3 + $0xaf0] sm:$0xff]  ;;  %v861_v61 = vld [vmem:[%s4399_s3 + $0xb08] sm:$0xff] }
 0x16c   :  { %1080 = vmatmul.mubr.f32.gmra.mrb[12].mxu1 %v3381_v53  ;;  %1347 = vmatmul.mubr.f32.gmra.mrb[12].mxu0 %v3381_v53  ;;  %v2301_v53 = vpack.c.bf16 %v794_v59, %v790_v1  ;;  %v828_v1 = vld [vmem:[%s4399_s3 + $0xa00] sm:$0xff]  ;;  %v2139_v35 = vpack.c.bf16 %v857_v30, %v853_v28  ;;  %v2143_v54 = vpack.c.bf16 %v865_v41, %v861_v61  ;;  %v886_v28 = vld [vmem:[%s4399_s3 + $0xbd0] sm:$0xff]  ;;  %v358_v61 = vld [vmem:[#allocation2 + $0x48] sm:$0xff] }
 0x16d   :  { %1085 = vmatprep.mubr.f32.mxu1 %v3434_v16  ;;  %2106 = vmatpush1.bf16.msra.mxu1 %v2105_v58  ;;  %v829_v58 = vld [vmem:[%s4399_s3 + $0xa08] sm:$0xff]  ;;  %v832_v59 = vld [vmem:[%s4399_s3 + $0xa20] sm:$0xff]  ;;  %v890_v30 = vld [vmem:[%s4399_s3 + $0xbf0] sm:$0xff] }
 0x16e   :  { %1352 = vmatprep.mubr.f32.mxu0 %v3434_v16  ;;  %2298 = vmatpush1.bf16.msra.mxu0 %v2297_v21  ;;  %v802_v16 = vld [vmem:[%s4399_s3 + $0x930] sm:$0xff]  ;;  %v831_v21 = vld [vmem:[%s4399_s3 + $0xa18] sm:$0xff]  ;;  %v2129_v9 = vpack.c.bf16 %v832_v59, %v828_v1  ;;  %v856_v37 = vld [vmem:[%s4399_s3 + $0xae0] sm:$0xff] }
 0x16f   :  { %2108 = vmatprep.subr.bf16.mxu1 %v2107_v63  ;;  %2300 = vmatprep.subr.bf16.mxu0 %v2299_v0  ;;  %v2305_v3 = vpack.c.bf16 %v802_v16, %v798_v12  ;;  %v2317_v63 = vpack.c.bf16 %v826_v57, %v822_v44  ;;  %v2127_v0 = vpack.c.bf16 %v833_v60, %v829_v58  ;;  %v838_v16 = vld [vmem:[%s4399_s3 + $0xa50] sm:$0xff]  ;;  %v864_v44 = vld [vmem:[%s4399_s3 + $0xb20] sm:$0xff]  ;;  %v869_v60 = vld [vmem:[%s4399_s3 + $0xb48] sm:$0xff] }
 0x170   :  { %1086 = vmatmul.mubr.f32.gmra.mrb[14].mxu1 %v3423_v11  ;;  %1353 = vmatmul.mubr.f32.gmra.mrb[14].mxu0 %v3423_v11  ;;  %v804_v11 = vld [vmem:[%s4399_s3 + $0x940] sm:$0xff]  ;;  %v2319_v2 = vpack.c.bf16 %v835_v62, %v831_v21  ;;  %v2131_v12 = vpack.c.bf16 %v841_v8, %v837_v4  ;;  %v866_v58 = vld [vmem:[%s4399_s3 + $0xb30] sm:$0xff]  ;;  %v873_v21 = vld [vmem:[%s4399_s3 + $0xb68] sm:$0xff] }
 0x171   :  { %2110 = vmatpush1.bf16.msra.mxu1 %v2109_v45  ;;  %1156 = vmatprep.mubr.f32.mxu1 %v479_v17  ;;  %v2117_v32 = vpack.c.bf16 %v808_v23, %v804_v11  ;;  %v839_v45 = vld [vmem:[%s4399_s3 + $0xa58] sm:$0xff]  ;;  %v844_v23 = vld [vmem:[%s4399_s3 + $0xa80] sm:$0xff]  ;;  %v2147_v1 = vpack.c.bf16 %v873_v21, %v869_v60  ;;  %v874_v4 = vld [vmem:[%s4399_s3 + $0xb70] sm:$0xff] }
 0x172   :  { %2302 = vmatpush1.bf16.msra.mxu0 %v2301_v53  ;;  %1423 = vmatprep.mubr.f32.mxu0 %v479_v17  ;;  %v843_v53 = vld [vmem:[%s4399_s3 + $0xa78] sm:$0xff]  ;;  %v845_v17 = vld [vmem:[%s4399_s3 + $0xa88] sm:$0xff]  ;;  %v868_v59 = vld [vmem:[%s4399_s3 + $0xb40] sm:$0xff] }
 0x173   :  { %2112 = vmatprep.subr.bf16.mxu1 %v2111_v13  ;;  %2304 = vmatprep.subr.bf16.mxu0 %v2303_v14  ;;  %v836_v13 = vld [vmem:[%s4399_s3 + $0xa40] sm:$0xff]  ;;  %v2323_v47 = vpack.c.bf16 %v843_v53, %v839_v45  ;;  %v2135_v11 = vpack.c.bf16 %v849_v18, %v845_v17  ;;  %v871_v62 = vld [vmem:[%s4399_s3 + $0xb58] sm:$0xff]  ;;  %v877_v8 = vld [vmem:[%s4399_s3 + $0xb88] sm:$0xff] }
 0x174   :  { %v840_v14 = vld [vmem:[%s4399_s3 + $0xa60] sm:$0xff]  ;;  %v881_v45 = vld [vmem:[%s4399_s3 + $0xba8] sm:$0xff]  ;;  %v879_v53 = vld [vmem:[%s4399_s3 + $0xb98] sm:$0xff] }
 0x175   :  { %2114 = vmatpush1.bf16.msra.mxu1 %v2113_v20  ;;  %v851_v20 = vld [vmem:[%s4399_s3 + $0xab8] sm:$0xff]  ;;  %v882_v17 = vld [vmem:[%s4399_s3 + $0xbb0] sm:$0xff]  ;;  %v885_v18 = vld [vmem:[%s4399_s3 + $0xbc8] sm:$0xff] }
 0x176   :  { %2306 = vmatpush1.bf16.msra.mxu0 %v2305_v3  ;;  %2116 = vmatprep.subr.bf16.mxu1 %v2115_v22  ;;  %v2133_v3 = vpack.c.bf16 %v840_v14, %v836_v13  ;;  %v2325_v22 = vpack.c.bf16 %v842_v15, %v838_v16  ;;  %v2327_v26 = vpack.c.bf16 %v851_v20, %v847_v19  ;;  %v876_v14 = vld [vmem:[%s4399_s3 + $0xb80] sm:$0xff]  ;;  %v889_v19 = vld [vmem:[%s4399_s3 + $0xbe8] sm:$0xff]  ;;  %v887_v20 = vld [vmem:[%s4399_s3 + $0xbd8] sm:$0xff] }
 0x177   :  { %2308 = vmatprep.subr.bf16.mxu0 %v2307_v25  ;;  %v846_v25 = vld [vmem:[%s4399_s3 + $0xa90] sm:$0xff]  ;;  %v2151_v13 = vpack.c.bf16 %v881_v45, %v877_v8  ;;  %v880_v16 = vld [vmem:[%s4399_s3 + $0xba0] sm:$0xff]  ;;  %v1539_v8 = vld [vmem:[%s4401_s5 + $0x98] sm:$0xff] }
 0x178   :  { %v359_v60 = vld [vmem:[#allocation2 + $0x50] sm:$0x1]  ;;  %v1551_v41 = vld [vmem:[%s4401_s5 + $0xf8] sm:$0xff] }
 0x179   :  { %2118 = vmatpush1.bf16.msra.mxu1 %v2117_v32  ;;  %v859_v32 = vld [vmem:[%s4399_s3 + $0xaf8] sm:$0xff] }
 0x17a   :  { %2310 = vmatpush1.bf16.msra.mxu0 %v2309_v33  ;;  %2120 = vmatprep.subr.bf16.mxu1 %v2119_v34  ;;  %v2137_v33 = vpack.c.bf16 %v848_v24, %v844_v23  ;;  %v2329_v34 = vpack.c.bf16 %v850_v27, %v846_v25  ;;  %v2331_v39 = vpack.c.bf16 %v859_v32, %v855_v31  ;;  %v884_v24 = vld [vmem:[%s4399_s3 + $0xbc0] sm:$0xff] }
 0x17b   :  { %2312 = vmatprep.subr.bf16.mxu0 %v2311_v38  ;;  %v854_v38 = vld [vmem:[%s4399_s3 + $0xad0] sm:$0xff]  ;;  %v2155_v23 = vpack.c.bf16 %v889_v19, %v885_v18  ;;  %v888_v25 = vld [vmem:[%s4399_s3 + $0xbe0] sm:$0xff]  ;;  %v1543_v18 = vld [vmem:[%s4401_s5 + $0xb8] sm:$0xff] }
 0x17c   :  { %v353_v31 = vld [vmem:[#allocation2 + $0x20] sm:$0xff]  ;;  %v2157_v32 = vpack.c.bf16 %v888_v25, %v884_v24 }
 0x17d   :  { %2122 = vmatpush1.bf16.msra.mxu1 %v2121_v48  ;;  %v867_v48 = vld [vmem:[%s4399_s3 + $0xb38] sm:$0xff]  ;;  %v1528_v25 = vld [vmem:[%s4401_s5 + $0x40] sm:$0xff] }
 0x17e   :  { %2314 = vmatpush1.bf16.msra.mxu0 %v2313_v51  ;;  %2124 = vmatprep.subr.bf16.mxu1 %v2123_v52  ;;  %v2141_v51 = vpack.c.bf16 %v856_v37, %v852_v36  ;;  %v2333_v52 = vpack.c.bf16 %v858_v40, %v854_v38  ;;  %v2335_v57 = vpack.c.bf16 %v867_v48, %v863_v42  ;;  %v475_v37 = vrot.slane %v353_v31, 1 }
 0x17f   :  { %2316 = vmatprep.subr.bf16.mxu0 %v2315_v56  ;;  %v862_v56 = vld [vmem:[%s4399_s3 + $0xb10] sm:$0xff]  ;;  %v365_v42 = vadd.s32 24, %v3271_v43 }
 0x181   :  { %2126 = vmatpush1.bf16.msra.mxu1 %v2125_v49  ;;  %v875_v49 = vld [vmem:[%s4399_s3 + $0xb78] sm:$0xff] }
 0x182   :  { %2318 = vmatpush1.bf16.msra.mxu0 %v2317_v63  ;;  %2128 = vmatprep.subr.bf16.mxu1 %v2127_v0  ;;  %v2145_v63 = vpack.c.bf16 %v864_v44, %v860_v55  ;;  %v2337_v0 = vpack.c.bf16 %v866_v58, %v862_v56  ;;  %v2339_v6 = vpack.c.bf16 %v875_v49, %v871_v62  ;;  %v357_v55 = vld [vmem:[#allocation2 + $0x40] sm:$0xff]  ;;  %v360_v44 = vld [vmem:[#allocation2 + $0x58] sm:$0x1]  ;;  %v391_v56 = vand.u32 15, %v365_v42 }
 0x183   :  { %2320 = vmatprep.subr.bf16.mxu0 %v2319_v2  ;;  %v870_v2 = vld [vmem:[%s4399_s3 + $0xb50] sm:$0xff]  ;;  %v484_v58 = vrot.slane %v357_v55, 1  ;;  %v488_v62 = vrot.slane %v359_v60, 1  ;;  %v1569_v55 = vld [vmem:[%s4401_s5 + $0x188] sm:$0xff] }
 0x184   :  { %vm1800_vm5 = vcmp.ne.s32.totalorder %v391_v56, 15  ;;  %v892_v56 = vld [vmem:[%s4400_s4] sm:$0xf] }
 0x185   :  { %2130 = vmatpush1.bf16.msra.mxu1 %v2129_v9  ;;  %v883_v9 = vld [vmem:[%s4399_s3 + $0xbb8] sm:$0xff] }
 0x186   :  { %2322 = vmatpush1.bf16.msra.mxu0 %v2321_v10  ;;  %2132 = vmatprep.subr.bf16.mxu1 %v2131_v12  ;;  %v2149_v10 = vpack.c.bf16 %v872_v50, %v868_v59  ;;  %v2341_v12 = vpack.c.bf16 %v874_v4, %v870_v2  ;;  %v2343_v15 = vpack.c.bf16 %v883_v9, %v879_v53  ;;  %v1520_v50 = vld [vmem:[%s4401_s5] sm:$0xff]  ;;  %v1521_v2 = vld [vmem:[%s4401_s5 + $0x8] sm:$0xff]  ;;  %v1538_v4 = vld [vmem:[%s4401_s5 + $0x90] sm:$0xff] }
 0x187   :  { %2324 = vmatprep.subr.bf16.mxu0 %v2323_v47  ;;  %v878_v47 = vld [vmem:[%s4399_s3 + $0xb90] sm:$0xff]  ;;  %v2355_v45 = vpack.c.bf16 %v1539_v8, %v1538_v4  ;;  %v1523_v9 = vld [vmem:[%s4401_s5 + $0x18] sm:$0xff] }
 0x188   :  { %v1522_v53 = vld [vmem:[%s4401_s5 + $0x10] sm:$0xff] }
 0x189   :  { %2134 = vmatpush1.bf16.msra.mxu1 %v2133_v3  ;;  %v891_v3 = vld [vmem:[%s4399_s3 + $0xbf8] sm:$0xff] }
 0x18a   :  { %2326 = vmatpush1.bf16.msra.mxu0 %v2325_v22  ;;  %2136 = vmatprep.subr.bf16.mxu1 %v2135_v11  ;;  %v2153_v22 = vpack.c.bf16 %v880_v16, %v876_v14  ;;  %v2345_v11 = vpack.c.bf16 %v882_v17, %v878_v47  ;;  %v2347_v27 = vpack.c.bf16 %v891_v3, %v887_v20  ;;  %v1524_v16 = vld [vmem:[%s4401_s5 + $0x20] sm:$0xff]  ;;  %v1525_v47 = vld [vmem:[%s4401_s5 + $0x28] sm:$0xff]  ;;  %v1542_v17 = vld [vmem:[%s4401_s5 + $0xb0] sm:$0xff] }
 0x18b   :  { %2328 = vmatprep.subr.bf16.mxu0 %v2327_v26  ;;  %v363_v26 = vadd.s32 8, %v3271_v43  ;;  %v2363_v19 = vpack.c.bf16 %v1543_v18, %v1542_v17  ;;  %v1526_v20 = vld [vmem:[%s4401_s5 + $0x30] sm:$0xff]  ;;  %v1527_v3 = vld [vmem:[%s4401_s5 + $0x38] sm:$0xff] }
 0x18d   :  { %2138 = vmatpush1.bf16.msra.mxu1 %v2137_v33  ;;  %v356_v33 = vld [vmem:[#allocation2 + $0x38] sm:$0xff]  ;;  %v377_v36 = vand.u32 15, %v363_v26  ;;  %v1529_v26 = vld [vmem:[%s4401_s5 + $0x48] sm:$0xff] }
 0x18e   :  { %2330 = vmatpush1.bf16.msra.mxu0 %v2329_v34  ;;  %2140 = vmatprep.subr.bf16.mxu1 %v2139_v35  ;;  %v2349_v34 = vpack.c.bf16 %v890_v30, %v886_v28  ;;  %v351_v35 = vld [vmem:[#allocation2 + $0x10] sm:$0xfe]  ;;  %v482_v38 = vrot.slane %v356_v33, 1  ;;  %v1547_v30 = vld [vmem:[%s4401_s5 + $0xd8] sm:$0xff] }
 0x18f   :  { %2332 = vmatprep.subr.bf16.mxu0 %v2331_v39  ;;  %v355_v39 = vld [vmem:[#allocation2 + $0x30] sm:$0xff]  ;;  %v474_v40 = vrot.slane %v351_v35, 1  ;;  %vm4154_vm4 = vcmp.ne.s32.totalorder %v377_v36, 15  ;;  %v1531_v33 = vld [vmem:[%s4401_s5 + $0x58] sm:$0xff]  ;;  %v1548_v35 = vld [vmem:[%s4401_s5 + $0xe0] sm:$0xff] }
 0x190   :  { %v1546_v28 = vld [vmem:[%s4401_s5 + $0xd0] sm:$0xff]  ;;  %v1549_v36 = vld [vmem:[%s4401_s5 + $0xe8] sm:$0xff] }
 0x191   :  { %2142 = vmatpush1.bf16.msra.mxu1 %v2141_v51  ;;  %v476_v48 = vsel %vm473_vm3, %v474_v40, %v475_v37  ;;  %v480_v51 = vrot.slane %v355_v39, 1  ;;  %v2371_v31 = vpack.c.bf16 %v1547_v30, %v1546_v28  ;;  %v1533_v39 = vld [vmem:[%s4401_s5 + $0x68] sm:$0xff] }
 0x192   :  { %2334 = vmatpush1.bf16.msra.mxu0 %v2333_v52  ;;  %2144 = vmatprep.subr.bf16.mxu1 %v2143_v54  ;;  %v483_v52 = vsel %vm473_vm3, %v478_v5, %v482_v38  ;;  %v486_v54 = vrot.slane %v358_v61, 1  ;;  %v490_v5 = vrot.slane %v360_v44, 1  ;;  %v1550_v61 = vld [vmem:[%s4401_s5 + $0xf0] sm:$0xff] }
 0x193   :  { %2336 = vmatprep.subr.bf16.mxu0 %v2335_v57  ;;  %v481_v57 = vsel %vm473_vm3, %v475_v37, %v480_v51  ;;  %v485_v21 = vsel %vm473_vm3, %v480_v51, %v484_v58  ;;  %v2375_v37 = vpack.c.bf16 %v1549_v36, %v1548_v35  ;;  %v2379_v42 = vpack.c.bf16 %v1551_v41, %v1550_v61  ;;  %v1535_v51 = vld [vmem:[%s4401_s5 + $0x78] sm:$0xff] }
 0x194   :  { %v487_v29 = vsel %vm473_vm3, %v482_v38, %v486_v54  ;;  %v491_v49 = vsel %vm473_vm3, %v486_v54, %v490_v5  ;;  %v1532_v38 = vld [vmem:[%s4401_s5 + $0x60] sm:$0xff] }
 0x195   :  { %2146 = vmatpush1.bf16.msra.mxu1 %v2145_v63  ;;  %v489_v63 = vsel %vm473_vm3, %v484_v58, %v488_v62  ;;  %v2377_v40 = vpack.c.bf16 %v1533_v39, %v1532_v38  ;;  %v1568_v54 = vld [vmem:[%s4401_s5 + $0x180] sm:$0xff]  ;;  %v908_v58 = vsub.s32 3, %v3271_v43 }
 0x196   :  { %2338 = vmatpush1.bf16.msra.mxu0 %v2337_v0  ;;  %2148 = vmatprep.subr.bf16.mxu1 %v2147_v1  ;;  %v1536_v0 = vld [vmem:[%s4401_s5 + $0x80] sm:$0xff]  ;;  %v1537_v1 = vld [vmem:[%s4401_s5 + $0x88] sm:$0xff]  ;;  %v2383_v44 = vpack.c.bf16 %v1569_v55, %v1568_v54 }
 0x197   :  { %2340 = vmatprep.subr.bf16.mxu0 %v2339_v6  ;;  %v2351_v59 = vpack.c.bf16 %v1537_v1, %v1536_v0  ;;  %v2353_v6 = vpack.c.bf16 %v1521_v2, %v1520_v50 }
 0x199   :  { %2150 = vmatpush1.bf16.msra.mxu1 %v2149_v10  ;;  %v2357_v10 = vpack.c.bf16 %v1523_v9, %v1522_v53 }
 0x19a   :  { %2342 = vmatpush1.bf16.msra.mxu0 %v2341_v12  ;;  %2152 = vmatprep.subr.bf16.mxu1 %v2151_v13  ;;  %v1540_v12 = vld [vmem:[%s4401_s5 + $0xa0] sm:$0xff]  ;;  %v1541_v13 = vld [vmem:[%s4401_s5 + $0xa8] sm:$0xff] }
 0x19b   :  { %2344 = vmatprep.subr.bf16.mxu0 %v2343_v15  ;;  %v2359_v14 = vpack.c.bf16 %v1541_v13, %v1540_v12  ;;  %v2361_v15 = vpack.c.bf16 %v1525_v47, %v1524_v16 }
 0x19d   :  { %2154 = vmatpush1.bf16.msra.mxu1 %v2153_v22  ;;  %v2365_v22 = vpack.c.bf16 %v1527_v3, %v1526_v20 }
 0x19e   :  { %2346 = vmatpush1.bf16.msra.mxu0 %v2345_v11  ;;  %2156 = vmatprep.subr.bf16.mxu1 %v2155_v23  ;;  %v1544_v11 = vld [vmem:[%s4401_s5 + $0xc0] sm:$0xff]  ;;  %v1545_v23 = vld [vmem:[%s4401_s5 + $0xc8] sm:$0xff] }
 0x19f   :  { %2348 = vmatprep.subr.bf16.mxu0 %v2347_v27  ;;  %v2367_v24 = vpack.c.bf16 %v1545_v23, %v1544_v11  ;;  %v2369_v27 = vpack.c.bf16 %v1529_v26, %v1528_v25 }
 0x1a1   :  { %2158 = vmatpush1.bf16.msra.mxu1 %v2157_v32  ;;  %v1530_v32 = vld [vmem:[%s4401_s5 + $0x50] sm:$0xff] }
 0x1a2   :  { %2350 = vmatpush1.bf16.msra.mxu0 %v2349_v34  ;;  %2352 = vmatprep.subr.bf16.mxu1 %v2351_v59  ;;  %v2373_v34 = vpack.c.bf16 %v1531_v33, %v1530_v32 }
 0x1a4   :  { %1157 = vmatmul.mubr.f32.vlgmr.msra.gmra.mrb[8].mxu1 %v476_v48 }
 0x1a5   :  { %1424 = vmatmul.mubr.f32.vlgmr.msra.gmra.mrb[8].mxu0 %v476_v48  ;;  %1773 = vmatprep.mubr.msk.f32.mxu1 %vm4154_vm4, %v483_v52  ;;  %v1534_v48 = vld [vmem:[%s4401_s5 + $0x70] sm:$0xff] }
 0x1a6   :  { %1789 = vmatprep.mubr.msk.f32.mxu0 %vm4154_vm4, %v483_v52  ;;  %2354 = vmatpush3.bf16.msra.mxu1 %v2353_v6  ;;  %v2381_v52 = vpack.c.bf16 %v1535_v51, %v1534_v48 }
 0x1a7   :  { %2356 = vmatprep.subr.bf16.mxu1 %v2355_v45 }
 0x1a8   :  { %1775 = vmatmul.mubr.msk.f32.gmra.mrb[10].mxu1 %vm4154_vm4, %v481_v57 }
 0x1a9   :  { %1791 = vmatmul.mubr.msk.f32.gmra.mrb[10].mxu0 %vm4154_vm4, %v481_v57  ;;  %1168 = vmatprep.mubr.f32.mxu1 %v487_v29  ;;  %v904_v57 = vsub.s32 2, %v3271_v43 }
 0x1aa   :  { %1435 = vmatprep.mubr.f32.mxu0 %v487_v29  ;;  %2358 = vmatpush3.bf16.msra.mxu1 %v2357_v10  ;;  %v897_v29 = vrot.slane %v892_v56, %v139_v46 }
 0x1ab   :  { %2360 = vmatprep.subr.bf16.mxu1 %v2359_v14  ;;  %v905_v60 = vrot.slane %v892_v56, %v904_v57 }
 0x1ac   :  { %1169 = vmatmul.mubr.f32.gmra.mrb[12].mxu1 %v485_v21 }
 0x1ad   :  { %1436 = vmatmul.mubr.f32.gmra.mrb[12].mxu0 %v485_v21  ;;  %1777 = vmatprep.mubr.msk.f32.mxu1 %vm1800_vm5, %v491_v49  ;;  %v901_v21 = vrot.slane %v892_v56, %v143_v7 }
 0x1ae   :  { %1793 = vmatprep.mubr.msk.f32.mxu0 %vm1800_vm5, %v491_v49  ;;  %2362 = vmatpush3.bf16.msra.mxu1 %v2361_v15 }
 0x1af   :  { %2364 = vmatprep.subr.bf16.mxu1 %v2363_v19 }
 0x1b0   :  { %1779 = vmatmul.mubr.msk.f32.gmra.mrb[14].mxu1 %vm1800_vm5, %v489_v63 }
 0x1b1   :  { %1795 = vmatmul.mubr.msk.f32.gmra.mrb[14].mxu0 %vm1800_vm5, %v489_v63  ;;  %v909_v63 = vrot.slane %v892_v56, %v908_v58 }
 0x1b2   :  { %2366 = vmatpush3.bf16.msra.mxu1 %v2365_v22 }
 0x1b3   :  { %2368 = vmatprep.subr.bf16.mxu1 %v2367_v24 }
 0x1b6   :  { %2370 = vmatpush3.bf16.msra.mxu1 %v2369_v27 }
 0x1b7   :  { %2372 = vmatprep.subr.bf16.mxu1 %v2371_v31 }
 0x1ba   :  { %2374 = vmatpush3.bf16.msra.mxu1 %v2373_v34 }
 0x1bb   :  { %2376 = vmatprep.subr.bf16.mxu1 %v2375_v37 }
 0x1be   :  { %2378 = vmatpush3.bf16.msra.mxu1 %v2377_v40 }
 0x1bf   :  { %2380 = vmatprep.subr.bf16.mxu1 %v2379_v42 }
 0x1c2   :  { %2382 = vmatpush3.bf16.msra.mxu1 %v2381_v52 }
 0x1c3   :  { %2384 = vmatprep.subr.bf16.mxu1 %v2383_v44 }
 0x277   :  { %v1158_v5 = vpop.f32.mrb[8].mxu1 }
 0x278   :  { %v1425_v62 = vpop.f32.mrb[8].mxu0  ;;  %v1160_v49 = vpop.f32.mrb[9].mxu1  ;;  %v2431_v1 = vadd.f32 %v1158_v5, %v897_v29 }
 0x279   :  { %v1427_v0 = vpop.f32.mrb[9].mxu0  ;;  %v2439_v59 = vadd.f32 %v1425_v62, %v905_v60  ;;  %v2432_v50 = vadd.f32 %v1160_v49, %v901_v21 }
 0x27a   :  { %v2440_v6 = vadd.f32 %v1427_v0, %v909_v63  ;;  %v1448_v10 = vmax.f32 %v2431_v1, 0.0 }
 0x27b   :  { %v1164_v2 = vpop.f32.mrb[10].mxu1  ;;  %v1450_v43 = vmax.f32 %v2439_v59, 0.0  ;;  %v1449_v7 = vmax.f32 %v2432_v50, 0.0 }
 0x27c   :  { %v2433_v4 = vadd.f32 %v1164_v2, %v897_v29  ;;  %v1431_v8 = vpop.f32.mrb[10].mxu0  ;;  %v1166_v45 = vpop.f32.mrb[11].mxu1  ;;  %v1451_v15 = vmax.f32 %v2440_v6, 0.0 }
 0x27d   :  { %v2441_v53 = vadd.f32 %v1431_v8, %v905_v60  ;;  %v2434_v9 = vadd.f32 %v1166_v45, %v901_v21  ;;  %v1433_v46 = vpop.f32.mrb[11].mxu0 }
 0x27e   :  { %v1452_v12 = vmax.f32 %v2433_v4, 0.0  ;;  %v2442_v13 = vadd.f32 %v1433_v46, %v909_v63 }
 0x27f   :  { %v1454_v14 = vmax.f32 %v2441_v53, 0.0  ;;  %v1453_v16 = vmax.f32 %v2434_v9, 0.0  ;;  %v1170_v47 = vpop.f32.mrb[12].mxu1 }
 0x280   :  { %v1464_v17 = vadd.f32 %v1452_v12, %v1448_v10  ;;  %v1455_v18 = vmax.f32 %v2442_v13, 0.0  ;;  %v1437_v19 = vpop.f32.mrb[12].mxu0  ;;  %v1172_v20 = vpop.f32.mrb[13].mxu1  ;;  %v2435_v25 = vadd.f32 %v1170_v47, %v897_v29 }
 0x281   :  { %v1478_v3 = vadd.f32 %v1454_v14, %v1450_v43  ;;  %v1471_v22 = vadd.f32 %v1453_v16, %v1449_v7  ;;  %v1439_v11 = vpop.f32.mrb[13].mxu0  ;;  %v2443_v28 = vadd.f32 %v1437_v19, %v905_v60  ;;  %v2436_v30 = vadd.f32 %v1172_v20, %v901_v21 }
 0x282   :  { %v1465_v23 = vrot.slane %v1464_v17, 4  ;;  %v1485_v24 = vadd.f32 %v1455_v18, %v1451_v15  ;;  %v2444_v34 = vadd.f32 %v1439_v11, %v909_v63  ;;  %v1456_v48 = vmax.f32 %v2435_v25, 0.0 }
 0x283   :  { %v1479_v26 = vrot.slane %v1478_v3, 4  ;;  %v1472_v27 = vrot.slane %v1471_v22, 4  ;;  %v1176_v31 = vpop.f32.mrb[14].mxu1  ;;  %v1458_v54 = vmax.f32 %v2443_v28, 0.0  ;;  %v1457_v55 = vmax.f32 %v2436_v30, 0.0  ;;  %v1570_v28 = vld [vmem:[%s4401_s5 + $0x190] sm:$0xff] }
 0x284   :  { %v1466_v32 = vadd.f32 %v1465_v23, %v1464_v17  ;;  %v1486_v33 = vrot.slane %v1485_v24, 4  ;;  %v2437_v35 = vadd.f32 %v1176_v31, %v897_v29  ;;  %v1443_v36 = vpop.f32.mrb[14].mxu0  ;;  %v1178_v37 = vpop.f32.mrb[15].mxu1  ;;  %v1459_v58 = vmax.f32 %v2444_v34, 0.0  ;;  %v1552_v23 = vld [vmem:[%s4401_s5 + $0x100] sm:$0xff]  ;;  %v1571_v30 = vld [vmem:[%s4401_s5 + $0x198] sm:$0xff] }
 0x285   :  { %v1480_v38 = vadd.f32 %v1479_v26, %v1478_v3  ;;  %v1473_v39 = vadd.f32 %v1472_v27, %v1471_v22  ;;  %v2445_v40 = vadd.f32 %v1443_v36, %v905_v60  ;;  %v2438_v61 = vadd.f32 %v1178_v37, %v901_v21  ;;  %v1445_v41 = vpop.f32.mrb[15].mxu0 }
 0x286   :  { %v1487_v42 = vadd.f32 %v1486_v33, %v1485_v24  ;;  %v1460_v51 = vmax.f32 %v2437_v35, 0.0  ;;  %v2446_v52 = vadd.f32 %v1445_v41, %v909_v63  ;;  %v1467_v57 = vrot.slane %v1466_v32, 2  ;;  %v1553_v24 = vld [vmem:[%s4401_s5 + $0x108] sm:$0xff]  ;;  %v1555_v41 = vld [vmem:[%s4401_s5 + $0x118] sm:$0xff] }
 0x287   :  { %v1462_v44 = vmax.f32 %v2445_v40, 0.0  ;;  %v1461_v56 = vmax.f32 %v2438_v61, 0.0  ;;  %v1481_v29 = vrot.slane %v1480_v38, 2  ;;  %v1474_v49 = vrot.slane %v1473_v39, 2  ;;  %v1554_v61 = vld [vmem:[%s4401_s5 + $0x110] sm:$0xff] }
 0x288   :  { %v1492_v5 = vadd.f32 %v1460_v51, %v1456_v48  ;;  %v1463_v62 = vmax.f32 %v2446_v52, 0.0  ;;  %v1488_v59 = vrot.slane %v1487_v42, 2  ;;  %v1468_v6 = vadd.f32 %v1467_v57, %v1466_v32  ;;  %v1572_v51 = vld [vmem:[%s4401_s5 + $0x1a0] sm:$0xff]  ;;  %v1573_v52 = vld [vmem:[%s4401_s5 + $0x1a8] sm:$0xff]  ;;  %v1574_v57 = vld [vmem:[%s4401_s5 + $0x1b0] sm:$0xff] }
 0x289   :  { %v1506_v0 = vadd.f32 %v1462_v44, %v1458_v54  ;;  %v1499_v1 = vadd.f32 %v1461_v56, %v1457_v55  ;;  %v1482_v8 = vadd.f32 %v1481_v29, %v1480_v38  ;;  %v1475_v45 = vadd.f32 %v1474_v49, %v1473_v39  ;;  %v1556_v44 = vld [vmem:[%s4401_s5 + $0x120] sm:$0xff]  ;;  %v1557_v56 = vld [vmem:[%s4401_s5 + $0x128] sm:$0xff]  ;;  %v1558_v29 = vld [vmem:[%s4401_s5 + $0x130] sm:$0xff] }
 0x28a   :  { %v1493_v60 = vrot.slane %v1492_v5, 4  ;;  %v1513_v21 = vadd.f32 %v1463_v62, %v1459_v58  ;;  %v1489_v46 = vadd.f32 %v1488_v59, %v1487_v42  ;;  %v1469_v7 = vrot.slane %v1468_v6, 1  ;;  %v1575_v58 = vld [vmem:[%s4401_s5 + $0x1b8] sm:$0xff] }
 0x28b   :  { %v1507_v50 = vrot.slane %v1506_v0, 4  ;;  %v1500_v2 = vrot.slane %v1499_v1, 4  ;;  %v1483_v47 = vrot.slane %v1482_v8, 1  ;;  %v1476_v18 = vrot.slane %v1475_v45, 1  ;;  %v1559_v49 = vld [vmem:[%s4401_s5 + $0x138] sm:$0xff] }
 0x28c   :  { %v1494_v4 = vadd.f32 %v1493_v60, %v1492_v5  ;;  %v1514_v63 = vrot.slane %v1513_v21, 4  ;;  %v1490_v3 = vrot.slane %v1489_v46, 1  ;;  %v1470_v25 = vadd.f32 %v1469_v7, %v1468_v6  ;;  %v1579_v6 = vld [vmem:[%s4401_s5 + $0x1d8] sm:$0xff] }
 0x28d   :  { %v1508_v53 = vadd.f32 %v1507_v50, %v1506_v0  ;;  %v1501_v9 = vadd.f32 %v1500_v2, %v1499_v1  ;;  %v1477_v31 = vadd.f32 %v1476_v18, %v1475_v45  ;;  %v1484_v33 = vadd.f32 %v1483_v47, %v1482_v8  ;;  %v1576_v0 = vld [vmem:[%s4401_s5 + $0x1c0] sm:$0xff]  ;;  %v1577_v1 = vld [vmem:[%s4401_s5 + $0x1c8] sm:$0xff]  ;;  %v1578_v2 = vld [vmem:[%s4401_s5 + $0x1d0] sm:$0xff] }
 0x28e   :  { %v1495_v10 = vrot.slane %v1494_v4, 2  ;;  %v1515_v12 = vadd.f32 %v1514_v63, %v1513_v21  ;;  %v2385_v36 = vpack.c.bf16 %v1553_v24, %v1552_v23  ;;  %v1491_v37 = vadd.f32 %v1490_v3, %v1489_v46  ;;  %v1560_v21 = vld [vmem:[%s4401_s5 + $0x140] sm:$0xff]  ;;  %v1561_v50 = vld [vmem:[%s4401_s5 + $0x148] sm:$0xff]  ;;  %v1562_v8 = vld [vmem:[%s4401_s5 + $0x150] sm:$0xff] }
 0x28f   :  { %v1509_v13 = vrot.slane %v1508_v53, 2  ;;  %v1502_v43 = vrot.slane %v1501_v9, 2  ;;  %v2387_v40 = vpack.c.bf16 %v1571_v30, %v1570_v28  ;;  %v2389_v54 = vpack.c.bf16 %v1555_v41, %v1554_v61  ;;  %v1563_v45 = vld [vmem:[%s4401_s5 + $0x158] sm:$0xff]  ;;  %v1566_v47 = vld [vmem:[%s4401_s5 + $0x170] sm:$0xff]  ;;  %v1796_v3 = vld [vmem:[%s4402_s6] ss:$0 sm:$0xff] }
 0x290   :  { %v1496_v14 = vadd.f32 %v1495_v10, %v1494_v4  ;;  %v1516_v16 = vrot.slane %v1515_v12, 2  ;;  %v2391_v55 = vpack.c.bf16 %v1573_v52, %v1572_v51  ;;  %v2393_v5 = vpack.c.bf16 %v1557_v56, %v1556_v44  ;;  %v1583_v7 = vld [vmem:[%s4401_s5 + $0x1f8] sm:$0xff] }
 0x291   :  { %v1510_v15 = vadd.f32 %v1509_v13, %v1508_v53  ;;  %v1503_v17 = vadd.f32 %v1502_v43, %v1501_v9  ;;  %v2395_v62 = vpack.c.bf16 %v1575_v58, %v1574_v57  ;;  %v2397_v59 = vpack.c.bf16 %v1559_v49, %v1558_v29  ;;  %v1580_v53 = vld [vmem:[%s4401_s5 + $0x1e0] sm:$0xff]  ;;  %v1581_v9 = vld [vmem:[%s4401_s5 + $0x1e8] sm:$0xff]  ;;  %v1582_v43 = vld [vmem:[%s4401_s5 + $0x1f0] sm:$0xff] }
 0x292   :  { %v1497_v19 = vrot.slane %v1496_v14, 1  ;;  %v1517_v20 = vadd.f32 %v1516_v16, %v1515_v12  ;;  %v2399_v60 = vpack.c.bf16 %v1577_v1, %v1576_v0  ;;  %v2401_v4 = vpack.c.bf16 %v1561_v50, %v1560_v21  ;;  %v1564_v12 = vld [vmem:[%s4401_s5 + $0x160] sm:$0xff]  ;;  %v1565_v13 = vld [vmem:[%s4401_s5 + $0x168] sm:$0xff] }
 0x293   :  { %v1511_v22 = vrot.slane %v1510_v15, 1  ;;  %v1504_v11 = vrot.slane %v1503_v17, 1  ;;  %v2403_v63 = vpack.c.bf16 %v1579_v6, %v1578_v2  ;;  %v2405_v46 = vpack.c.bf16 %v1563_v45, %v1562_v8 }
 0x294   :  { %v1498_v26 = vadd.f32 %v1497_v19, %v1496_v14  ;;  %v1518_v27 = vrot.slane %v1517_v20, 1  ;;  %v2407_v10 = vpack.c.bf16 %v1581_v9, %v1580_v53  ;;  %v2409_v14 = vpack.c.bf16 %v1565_v13, %v1564_v12 }
 0x295   :  { %v1505_v32 = vadd.f32 %v1504_v11, %v1503_v17  ;;  %v1512_v34 = vadd.f32 %v1511_v22, %v1510_v15  ;;  %v2411_v16 = vpack.c.bf16 %v1583_v7, %v1582_v43  ;;  %v1567_v15 = vld [vmem:[%s4401_s5 + $0x178] sm:$0xff]  ;;  %s2481_s5 = scalar_lea.vmem %s1757_s10, 32 }
 0x296   :  { %v1600_v35 = vsel %vm1599_vm6, %v1498_v26, %v1470_v25  ;;  %v1519_v38 = vadd.f32 %v1518_v27, %v1517_v20  ;;  %v2413_v17 = vpack.c.bf16 %v1567_v15, %v1566_v47  ;;  %p2482_p0 = scmp.ne.s32.totalorder %s1757_s10, %s2481_s5  ;;  %p2487_p2 = scmp.lt.s32.totalorder %s2481_s5, %s2481_s5 }
 0x297   :  { %v1601_v39 = vsel %vm1599_vm6, %v1505_v32, %v1477_v31  ;;  %v1602_v42 = vsel %vm1599_vm6, %v1512_v34, %v1484_v33 }
 0x298   :  { %1672 = vmatprep.mubr.f32.mxu1 %v1601_v39  ;;  %v1603_v48 = vsel %vm1599_vm6, %v1519_v38, %v1491_v37  ;;  %p2488_p3 = por %p2487_p2, %p2486_p1 }
 0x299   :  { %1673 = vmatmul.mubr.f32.vlgmr.msra.gmra.mrb[16].mxu1 %v1600_v35 }
 0x29a   :  { %2386 = vmatpush3.bf16.msra.mxu1 %v2385_v36  ;;  %1742 = vmatprep.mubr.f32.mxu1 %v1603_v48  ;;  %p2489_p4 = pnand %p2488_p3, %p2482_p0 }
 0x29b   :  { %2388 = vmatprep.subr.bf16.mxu1 %v2387_v40 }
 0x29e   :  { %2390 = vmatpush3.bf16.msra.mxu1 %v2389_v54 }
 0x29f   :  { %2392 = vmatprep.subr.bf16.mxu1 %v2391_v55 }
 0x2a2   :  { %2394 = vmatpush3.bf16.msra.mxu1 %v2393_v5 }
 0x2a3   :  { %2396 = vmatprep.subr.bf16.mxu1 %v2395_v62 }
 0x2a6   :  { %2398 = vmatpush3.bf16.msra.mxu1 %v2397_v59 }
 0x2a7   :  { %2400 = vmatprep.subr.bf16.mxu1 %v2399_v60 }
 0x2aa   :  { %2402 = vmatpush3.bf16.msra.mxu1 %v2401_v4 }
 0x2ab   :  { %2404 = vmatprep.subr.bf16.mxu1 %v2403_v63 }
 0x2ae   :  { %2406 = vmatpush3.bf16.msra.mxu1 %v2405_v46 }
 0x2af   :  { %2408 = vmatprep.subr.bf16.mxu1 %v2407_v10 }
 0x2b2   :  { %2410 = vmatpush3.bf16.msra.mxu1 %v2409_v14 }
 0x2b3   :  { %2412 = vmatprep.subr.bf16.mxu1 %v2411_v16 }
 0x2b6   :  { %2414 = vmatpush3.bf16.msra.mxu1 %v2413_v17 }
 0x2b9   :  { %1743 = vmatmul.mubr.f32.vlgmr.msra.gmra.mrb[18].mxu1 %v1602_v42 }
 0x36c   :  { %v1833_v18 = vpop.f32.mrb[16].mxu1 }
 0x36d   :  { %v1834_v19 = vpop.f32.mrb[17].mxu1 }
 0x36e   :  { %v1835_v20 = vadd.f32 %v1834_v19, %v1833_v18 }
 0x370   :  { %v1675_v23 = vadd.f32 %v1835_v20, %v1796_v3 }
 0x38c   :  { %v1868_v22 = vpop.f32.mrb[18].mxu1 }
 0x38d   :  { %v1869_v11 = vpop.f32.mrb[19].mxu1 }
 0x38e   :  { %v1870_v24 = vadd.f32 %v1869_v11, %v1868_v22 }
 0x390   :  { %v1745_v25 = vadd.f32 %v1870_v24, %v1675_v23 }
 0x392   :  { %1749 = vst.msk [vmem:[#allocation3] sm:$0x3] %vm1748_vm7, %v1745_v25 }
 0x393   :  { %2492 = shalt.err (!%p2489_p4)
}
 0x394   :  { %s2493_s6 = scalar_lea.hbm %s4403_s7, 32 }
 0x395   :  { %p2494_p5 = scmp.ne.s32.totalorder %s4403_s7, %s2493_s6  ;;  %p2497_p6 = scmp.lt.u32.totalorder %s2493_s6, %s4403_s7 }
 0x397   :  { %p2499_p7 = pnand %p2497_p6, %p2494_p5 }
 0x399   :  { %2502 = shalt.err (!%p2499_p7)
}
 0x39a   :  { %1759 = dma.vmem_to_hbm [thread:$0]  %s1757_s10, 32, %s4403_s7, [#allocation4]  }
 0x39b   :  { %2503 = dma.done.wait [#allocation4], 32  }
 0x39c   :  { %2504 = vsyncadd [#allocation4], 4294967264 }
 0x39d   :  { %1763 = vsyncpa [#allocation4], 1 }

</bundles_post_ra>
